<compile_context>
chip_gen: v7x
topology: tpu7x:2x2x1
jax: 0.10.0
libtpu: 0.0.40
codegen_flags: <defaults>
</compile_context>

<pallas_src>
import functools

import jax
import jax.numpy as jnp
from jax import lax
from jax.experimental import pallas as pl
from jax.experimental.pallas import tpu as pltpu

# ----------------------------- static config --------------------------------
EMBED_DIM = 32
KERNELS = [3, 5]          # odd kernels -> "same" padding, no trimming branch
DILATIONS = [1, 2]
PATHWAYS = [(k, dil) for k in KERNELS for dil in DILATIONS]
NUM_PATHWAYS = len(PATHWAYS)
PAD = max(dil * (k - 1) // 2 for k, dil in PATHWAYS)        # = 4
LN_EPS = 1e-5
ALIGN = 8                  # sublane-aligned base offset of the tile in scratch
MAX_T_TILE = 1024          # rows per grid step (overhead amortization, not VMEM)


def _tap_offsets():
    """Distinct shifted-window offsets (relative to a PAD-padded tile)."""
    offs = set()
    for k, dil in PATHWAYS:
        pad_p = dil * (k - 1) // 2
        for j in range(k):
            offs.add(PAD - pad_p + j * dil)
    return tuple(sorted(offs))


OFFSETS = _tap_offsets()            # (0, 2, 3, 4, 5, 6, 8)
NUM_OFFSETS = len(OFFSETS)          # 7


def _gelu_exact(x):
    # matches torch.nn.functional.gelu (erf formulation)
    return 0.5 * x * (1.0 + lax.erf(x * 0.7071067811865476))


# ------------------------------- Pallas kernel -------------------------------
def conv_encoder_kernel(halo_ref, x_ref, w_ref, convb_ref, projw_ref, projb_ref,
                        gamma_ref, beta_ref, o_ref, xpad_ref):
    # halo_ref : (2*PAD, d)                left/right halo rows for this tile
    # x_ref    : (Tt, d)                   input tile (also the residual)
    # w_ref    : (NUM_OFFSETS, d, P*d)     offset-grouped conv weights (in, out)
    # convb_ref: (1, P*d)                  concatenated conv biases
    # projw_ref: (P*d, d)                  output_proj weight, (conv_ch, out)
    # projb_ref/gamma_ref/beta_ref : (1, d)
    # xpad_ref : (Tt + 2*ALIGN, d)         VMEM scratch holding the haloed tile
    Tt, d = x_ref.shape
    cd = w_ref.dtype                      # matmul compute dtype (f32 or bf16)

    # --- assemble the haloed tile in VMEM (replaces wrapper-side jnp.pad and
    #     the duplicate residual input). Tile sits at an 8-aligned offset so
    #     the big copy is an aligned store; only the 4-row halo writes are
    #     sublane-masked.
    xpad_ref[ALIGN - PAD:ALIGN, :] = halo_ref[0:PAD, :]
    xpad_ref[ALIGN:ALIGN + Tt, :] = x_ref[...]
    xpad_ref[ALIGN + Tt:ALIGN + Tt + PAD, :] = halo_ref[PAD:2 * PAD, :]

    # --- all pathways fused: one lane-dense (Tt, P*d) accumulator,
    #     one MXU dot per distinct tap offset (7 dots instead of 16 + 4).
    conv = jnp.broadcast_to(convb_ref[...], (Tt, NUM_PATHWAYS * d)).astype(jnp.float32)
    for oi, off in enumerate(OFFSETS):
        xs = xpad_ref[pl.ds(ALIGN - PAD + off, Tt), :].astype(cd)
        conv = conv + jnp.dot(xs, w_ref[oi], preferred_element_type=jnp.float32)
    conv = _gelu_exact(conv)                                   # single GELU, 128 lanes

    # --- single output projection of the (virtually) concatenated pathways
    proj = jnp.dot(conv.astype(cd), projw_ref[...], preferred_element_type=jnp.float32)

    # --- residual + LayerNorm (biased variance, eps = 1e-5, like torch.nn.LayerNorm)
    z = proj + projb_ref[...] + x_ref[...].astype(jnp.float32)
    mean = jnp.mean(z, axis=-1, keepdims=True)
    cent = z - mean
    var = jnp.mean(cent * cent, axis=-1, keepdims=True)
    out = cent * lax.rsqrt(var + LN_EPS) * gamma_ref[...] + beta_ref[...]
    # TODO(synk): nn.Dropout is identity at inference; training-mode dropout not implemented.
    o_ref[...] = out.astype(o_ref.dtype)


# ------------------------------- wrapper --------------------------------------
def _pick_t_tile(T, max_tile=MAX_T_TILE):
    if T <= max_tile:
        return T
    cand = max_tile - (max_tile % 8)
    while cand >= 8:
        if T % cand == 0:
            return cand
        cand -= 8
    return T    # fall back to whole-sequence blocks


def _build_halos(x, t_tile):
    """(B, nt, 2*PAD, d): left/right halo rows per time tile (zeros at edges)."""
    B, T, d = x.shape
    nt = T // t_tile
    zeros = jnp.zeros((B, PAD, d), x.dtype)
    lefts, rights = [], []
    for t in range(nt):
        lo, hi = t * t_tile, (t + 1) * t_tile
        lefts.append(zeros if t == 0 else x[:, lo - PAD:lo, :])
        rights.append(zeros if t == nt - 1 else x[:, hi:hi + PAD, :])
    left_arr = jnp.stack(lefts, axis=1)      # (B, nt, PAD, d)
    right_arr = jnp.stack(rights, axis=1)    # (B, nt, PAD, d)
    return jnp.concatenate([left_arr, right_arr], axis=2)


def conv_encoder_forward(x, w_off, conv_b, proj_w_t, proj_b2, gamma2, beta2, *,
                         t_tile=None):
    B, T, d = x.shape
    assert d == EMBED_DIM
    if t_tile is None:
        t_tile = _pick_t_tile(T)
    if T % t_tile != 0:
        raise ValueError(f"t_tile={t_tile} must divide T={T}")
    if t_tile != T and t_tile % 8 != 0:
        raise ValueError("t_tile must be a multiple of 8 (or the full sequence)")
    nt = T // t_tile

    halos = _build_halos(x, t_tile)          # tiny: (B, nt, 8, d)

    return pl.pallas_call(
        conv_encoder_kernel,
        out_shape=jax.ShapeDtypeStruct((B, T, d), x.dtype),
        grid_spec=pltpu.PrefetchScalarGridSpec(
            num_scalar_prefetch=0,
            grid=(B, nt),
            in_specs=[
                pl.BlockSpec((None, None, 2 * PAD, d), lambda b, t: (b, t, 0, 0)),
                pl.BlockSpec((None, t_tile, d), lambda b, t: (b, t, 0)),
                pl.BlockSpec((NUM_OFFSETS, d, NUM_PATHWAYS * d), lambda b, t: (0, 0, 0)),
                pl.BlockSpec((1, NUM_PATHWAYS * d), lambda b, t: (0, 0)),
                pl.BlockSpec((NUM_PATHWAYS * d, d), lambda b, t: (0, 0)),
                pl.BlockSpec((1, d), lambda b, t: (0, 0)),
                pl.BlockSpec((1, d), lambda b, t: (0, 0)),
                pl.BlockSpec((1, d), lambda b, t: (0, 0)),
            ],
            out_specs=pl.BlockSpec((None, t_tile, d), lambda b, t: (b, t, 0)),
            scratch_shapes=[pltpu.VMEM((t_tile + 2 * ALIGN, d), x.dtype)],
        ),
        compiler_params=pltpu.CompilerParams(
            dimension_semantics=("parallel", "parallel")),
    )(halos, x, w_off, conv_b, proj_w_t, proj_b2, gamma2, beta2)


# ------------------------- deterministic parameter init -----------------------
def init_params(key, d):
    keys = jax.random.split(key, 2 * NUM_PATHWAYS + 2)
    conv_ws, conv_bs = [], []
    i = 0
    for (k, dil) in PATHWAYS:
        bound = 1.0 / (d * k) ** 0.5
        conv_ws.append(jax.random.uniform(keys[i], (d, d, k), jnp.float32,
                                          -bound, bound)); i += 1
        conv_bs.append(jax.random.uniform(keys[i], (d,), jnp.float32,
                                          -bound, bound)); i += 1
    bound = 1.0 / (NUM_PATHWAYS * d) ** 0.5
    proj_w = jax.random.uniform(keys[i], (d, NUM_PATHWAYS * d), jnp.float32,
                                -bound, bound); i += 1
    proj_b = jax.random.uniform(keys[i], (d,), jnp.float32, -bound, bound)
    gamma = jnp.ones((d,), jnp.float32)
    beta = jnp.zeros((d,), jnp.float32)
    return conv_ws, conv_bs, proj_w, proj_b, gamma, beta


def pack_params(conv_ws, conv_bs, proj_w, proj_b, gamma, beta, d,
                weight_dtype=jnp.float32):
    """Host-side packing into the fused, offset-grouped layout."""
    # w_off[oi, :, p*d:(p+1)*d] = (in, out) weight of pathway p's tap at OFFSETS[oi]
    w_off = jnp.zeros((NUM_OFFSETS, d, NUM_PATHWAYS * d), jnp.float32)
    for p, (k, dil) in enumerate(PATHWAYS):
        pad_p = dil * (k - 1) // 2
        for j in range(k):
            off = PAD - pad_p + j * dil
            oi = OFFSETS.index(off)
            w_off = w_off.at[oi, :, p * d:(p + 1) * d].set(conv_ws[p][:, :, j].T)
    conv_b_flat = jnp.concatenate(conv_bs)[None, :]            # (1, P*d)
    proj_w_t = proj_w.T                                        # (P*d, d)
    return (w_off.astype(weight_dtype), conv_b_flat, proj_w_t.astype(weight_dtype),
            proj_b[None, :], gamma[None, :], beta[None, :])


# ------------------------------ pure-JAX reference ----------------------------
def reference_forward(x, conv_ws, conv_bs, proj_w, proj_b, gamma, beta):
    B, T, d = x.shape
    xc = jnp.transpose(x, (0, 2, 1))                           # (B, d, T) NCW
    outs = []
    for p, (k, dil) in enumerate(PATHWAYS):
        pad = dil * (k - 1) // 2
        y = lax.conv_general_dilated(
            xc, conv_ws[p], window_strides=(1,), padding=[(pad, pad)],
            rhs_dilation=(dil,), dimension_numbers=('NCH', 'OIH', 'NCH'))
        y = y + conv_bs[p][None, :, None]
        outs.append(_gelu_exact(y))
    cat = jnp.transpose(jnp.concatenate(outs, axis=1), (0, 2, 1))   # (B, T, P*d)
    out = cat @ proj_w.T + proj_b
    z = out + x
    mean = jnp.mean(z, axis=-1, keepdims=True)
    var = jnp.mean((z - mean) ** 2, axis=-1, keepdims=True)
    return (z - mean) * lax.rsqrt(var + LN_EPS) * gamma + beta


# ----------------------------------- main --------------------------------------
if __name__ == "__main__":
    d = EMBED_DIM
    key = jax.random.PRNGKey(0)
    k_x, k_p = jax.random.split(key)

    conv_ws, conv_bs, proj_w, proj_b, gamma, beta = init_params(k_p, d)
    packed_f32 = pack_params(conv_ws, conv_bs, proj_w, proj_b, gamma, beta, d)

    # Case 1: single time tile (B=2, T=128).
    x1 = jax.random.normal(k_x, (2, 128, d), jnp.float32)
    out1 = jax.block_until_ready(conv_encoder_forward(x1, *packed_f32))
    ref1 = jax.block_until_ready(
        reference_forward(x1, conv_ws, conv_bs, proj_w, proj_b, gamma, beta))
    assert out1.shape == x1.shape
    assert jnp.max(jnp.abs(out1 - ref1)) < 1e-4, "mismatch (single-tile) vs reference"

    # Case 2: multi-tile halo path + 2-D parallel grid (B=2, T=256, 4 time tiles).
    x2 = jax.random.normal(jax.random.fold_in(k_x, 1), (2, 256, d), jnp.float32)
    out2 = jax.block_until_ready(conv_encoder_forward(x2, *packed_f32, t_tile=64))
    ref2 = jax.block_until_ready(
        reference_forward(x2, conv_ws, conv_bs, proj_w, proj_b, gamma, beta))
    assert out2.shape == x2.shape
    assert jnp.max(jnp.abs(out2 - ref2)) < 1e-4, "mismatch (multi-tile) vs reference"

    # Case 3: optional bf16 matmul-weight fast path (looser tolerance).
    packed_bf16 = pack_params(conv_ws, conv_bs, proj_w, proj_b, gamma, beta, d,
                              weight_dtype=jnp.bfloat16)
    out3 = jax.block_until_ready(conv_encoder_forward(x2, *packed_bf16, t_tile=64))
    assert jnp.max(jnp.abs(out3 - ref2)) < 5e-2, "mismatch (bf16 path) vs reference"

    print("KERNEL_OK")
</pallas_src>

<mosaic_0001>
module attributes {stable_mosaic.version = 11 : i64} {
  func.func @conv_encoder_kernel(%arg0: i32, %arg1: i32, %arg2: memref<1x1x8x32xf32, #tpu.memory_space<vmem>>, %arg3: memref<1x128x32xf32, #tpu.memory_space<vmem>>, %arg4: memref<7x32x128xf32, #tpu.memory_space<vmem>>, %arg5: memref<1x128xf32, #tpu.memory_space<vmem>>, %arg6: memref<128x32xf32, #tpu.memory_space<vmem>>, %arg7: memref<1x32xf32, #tpu.memory_space<vmem>>, %arg8: memref<1x32xf32, #tpu.memory_space<vmem>>, %arg9: memref<1x32xf32, #tpu.memory_space<vmem>>, %arg10: memref<1x128x32xf32, #tpu.memory_space<vmem>>, %arg11: memref<144x32xf32, #tpu.memory_space<vmem>>) attributes {dimension_semantics = [#tpu.dimension_semantics<parallel>, #tpu.dimension_semantics<parallel>], iteration_bounds = array<i64: 2, 1>, scalar_prefetch = 0 : i64, scratch_operands = 1 : i64, tpu.core_type = #tpu.core_type<tc>, window_params = [{transform_indices = @transform_0, window_bounds = array<i64: 1, 1, 8, 32>}, {transform_indices = @transform_1, window_bounds = array<i64: 1, 128, 32>}, {pipeline_mode = #tpu.pipeline_mode<synchronous>, transform_indices = @transform_2, window_bounds = array<i64: 7, 32, 128>}, {pipeline_mode = #tpu.pipeline_mode<synchronous>, transform_indices = @transform_3, window_bounds = array<i64: 1, 128>}, {pipeline_mode = #tpu.pipeline_mode<synchronous>, transform_indices = @transform_4, window_bounds = array<i64: 128, 32>}, {pipeline_mode = #tpu.pipeline_mode<synchronous>, transform_indices = @transform_5, window_bounds = array<i64: 1, 32>}, {pipeline_mode = #tpu.pipeline_mode<synchronous>, transform_indices = @transform_6, window_bounds = array<i64: 1, 32>}, {pipeline_mode = #tpu.pipeline_mode<synchronous>, transform_indices = @transform_7, window_bounds = array<i64: 1, 32>}, {transform_indices = @transform_8, window_bounds = array<i64: 1, 128, 32>}]} {
    %c0 = arith.constant 0 : index
    %c0_0 = arith.constant 0 : index
    %c0_1 = arith.constant 0 : index
    %c0_2 = arith.constant 0 : index
    %0 = vector.load %arg2[%c0, %c0_0, %c0_1, %c0_2] : memref<1x1x8x32xf32, #tpu.memory_space<vmem>>, vector<1x1x4x32xf32>
    %1 = vector.shape_cast %0 : vector<1x1x4x32xf32> to vector<4x32xf32>
    %c4 = arith.constant 4 : index
    %c0_3 = arith.constant 0 : index
    %2 = vector.load %arg11[%c4, %c0_3] : memref<144x32xf32, #tpu.memory_space<vmem>>, vector<4x32xf32>
    tpu.vector_store %arg11[%c4, %c0_3], %1 {strides = array<i32>} : memref<144x32xf32, #tpu.memory_space<vmem>>, vector<4x32xf32>,
    %c0_4 = arith.constant 0 : index
    %c0_5 = arith.constant 0 : index
    %c0_6 = arith.constant 0 : index
    %3 = vector.load %arg3[%c0_4, %c0_5, %c0_6] : memref<1x128x32xf32, #tpu.memory_space<vmem>>, vector<1x128x32xf32>
    %4 = vector.shape_cast %3 : vector<1x128x32xf32> to vector<128x32xf32>
    %c8 = arith.constant 8 : index
    %c0_7 = arith.constant 0 : index
    %5 = vector.load %arg11[%c8, %c0_7] : memref<144x32xf32, #tpu.memory_space<vmem>>, vector<128x32xf32>
    tpu.vector_store %arg11[%c8, %c0_7], %4 {strides = array<i32>} : memref<144x32xf32, #tpu.memory_space<vmem>>, vector<128x32xf32>,
    %c0_8 = arith.constant 0 : index
    %c0_9 = arith.constant 0 : index
    %c4_10 = arith.constant 4 : index
    %c0_11 = arith.constant 0 : index
    %6 = vector.load %arg2[%c0_8, %c0_9, %c4_10, %c0_11] : memref<1x1x8x32xf32, #tpu.memory_space<vmem>>, vector<1x1x4x32xf32>
    %7 = vector.shape_cast %6 : vector<1x1x4x32xf32> to vector<4x32xf32>
    %c136 = arith.constant 136 : index
    %c0_12 = arith.constant 0 : index
    %8 = vector.load %arg11[%c136, %c0_12] : memref<144x32xf32, #tpu.memory_space<vmem>>, vector<4x32xf32>
    tpu.vector_store %arg11[%c136, %c0_12], %7 {strides = array<i32>} : memref<144x32xf32, #tpu.memory_space<vmem>>, vector<4x32xf32>,
    %c0_13 = arith.constant 0 : index
    %c0_14 = arith.constant 0 : index
    %9 = vector.load %arg5[%c0_13, %c0_14] : memref<1x128xf32, #tpu.memory_space<vmem>>, vector<1x128xf32>
    %10 = vector.shape_cast %9 : vector<1x128xf32> to vector<1x128xf32>
    %11 = vector.broadcast %10 : vector<1x128xf32> to vector<128x128xf32>
    %c4_15 = arith.constant 4 : index
    %c0_16 = arith.constant 0 : index
    %12 = vector.load %arg11[%c4_15, %c0_16] : memref<144x32xf32, #tpu.memory_space<vmem>>, vector<128x32xf32>
    %c0_17 = arith.constant 0 : index
    %c0_18 = arith.constant 0 : index
    %c0_19 = arith.constant 0 : index
    %13 = vector.load %arg4[%c0_17, %c0_18, %c0_19] : memref<7x32x128xf32, #tpu.memory_space<vmem>>, vector<1x32x128xf32>
    %14 = vector.shape_cast %13 : vector<1x32x128xf32> to vector<32x128xf32>
    %cst = arith.constant dense<0.000000e+00> : vector<128x128xf32>
    %15 = tpu.matmul %12, %14, %cst {dimension_numbers = #tpu.dot_dimension_numbers<[1], [0], [0], [1], [0, 0, 1, 1], [], []>} : vector<128x32xf32>, vector<32x128xf32>, vector<128x128xf32> -> vector<128x128xf32>
    %16 = arith.addf %11, %15 : vector<128x128xf32>
    %c6 = arith.constant 6 : index
    %c0_20 = arith.constant 0 : index
    %17 = vector.load %arg11[%c6, %c0_20] : memref<144x32xf32, #tpu.memory_space<vmem>>, vector<128x32xf32>
    %c1 = arith.constant 1 : index
    %c0_21 = arith.constant 0 : index
    %c0_22 = arith.constant 0 : index
    %18 = vector.load %arg4[%c1, %c0_21, %c0_22] : memref<7x32x128xf32, #tpu.memory_space<vmem>>, vector<1x32x128xf32>
    %19 = vector.shape_cast %18 : vector<1x32x128xf32> to vector<32x128xf32>
    %cst_23 = arith.constant dense<0.000000e+00> : vector<128x128xf32>
    %20 = tpu.matmul %17, %19, %cst_23 {dimension_numbers = #tpu.dot_dimension_numbers<[1], [0], [0], [1], [0, 0, 1, 1], [], []>} : vector<128x32xf32>, vector<32x128xf32>, vector<128x128xf32> -> vector<128x128xf32>
    %21 = arith.addf %16, %20 : vector<128x128xf32>
    %c7 = arith.constant 7 : index
    %c0_24 = arith.constant 0 : index
    %22 = vector.load %arg11[%c7, %c0_24] : memref<144x32xf32, #tpu.memory_space<vmem>>, vector<128x32xf32>
    %c2 = arith.constant 2 : index
    %c0_25 = arith.constant 0 : index
    %c0_26 = arith.constant 0 : index
    %23 = vector.load %arg4[%c2, %c0_25, %c0_26] : memref<7x32x128xf32, #tpu.memory_space<vmem>>, vector<1x32x128xf32>
    %24 = vector.shape_cast %23 : vector<1x32x128xf32> to vector<32x128xf32>
    %cst_27 = arith.constant dense<0.000000e+00> : vector<128x128xf32>
    %25 = tpu.matmul %22, %24, %cst_27 {dimension_numbers = #tpu.dot_dimension_numbers<[1], [0], [0], [1], [0, 0, 1, 1], [], []>} : vector<128x32xf32>, vector<32x128xf32>, vector<128x128xf32> -> vector<128x128xf32>
    %26 = arith.addf %21, %25 : vector<128x128xf32>
    %c8_28 = arith.constant 8 : index
    %c0_29 = arith.constant 0 : index
    %27 = vector.load %arg11[%c8_28, %c0_29] : memref<144x32xf32, #tpu.memory_space<vmem>>, vector<128x32xf32>
    %c3 = arith.constant 3 : index
    %c0_30 = arith.constant 0 : index
    %c0_31 = arith.constant 0 : index
    %28 = vector.load %arg4[%c3, %c0_30, %c0_31] : memref<7x32x128xf32, #tpu.memory_space<vmem>>, vector<1x32x128xf32>
    %29 = vector.shape_cast %28 : vector<1x32x128xf32> to vector<32x128xf32>
    %cst_32 = arith.constant dense<0.000000e+00> : vector<128x128xf32>
    %30 = tpu.matmul %27, %29, %cst_32 {dimension_numbers = #tpu.dot_dimension_numbers<[1], [0], [0], [1], [0, 0, 1, 1], [], []>} : vector<128x32xf32>, vector<32x128xf32>, vector<128x128xf32> -> vector<128x128xf32>
    %31 = arith.addf %26, %30 : vector<128x128xf32>
    %c9 = arith.constant 9 : index
    %c0_33 = arith.constant 0 : index
    %32 = vector.load %arg11[%c9, %c0_33] : memref<144x32xf32, #tpu.memory_space<vmem>>, vector<128x32xf32>
    %c4_34 = arith.constant 4 : index
    %c0_35 = arith.constant 0 : index
    %c0_36 = arith.constant 0 : index
    %33 = vector.load %arg4[%c4_34, %c0_35, %c0_36] : memref<7x32x128xf32, #tpu.memory_space<vmem>>, vector<1x32x128xf32>
    %34 = vector.shape_cast %33 : vector<1x32x128xf32> to vector<32x128xf32>
    %cst_37 = arith.constant dense<0.000000e+00> : vector<128x128xf32>
    %35 = tpu.matmul %32, %34, %cst_37 {dimension_numbers = #tpu.dot_dimension_numbers<[1], [0], [0], [1], [0, 0, 1, 1], [], []>} : vector<128x32xf32>, vector<32x128xf32>, vector<128x128xf32> -> vector<128x128xf32>
    %36 = arith.addf %31, %35 : vector<128x128xf32>
    %c10 = arith.constant 10 : index
    %c0_38 = arith.constant 0 : index
    %37 = vector.load %arg11[%c10, %c0_38] : memref<144x32xf32, #tpu.memory_space<vmem>>, vector<128x32xf32>
    %c5 = arith.constant 5 : index
    %c0_39 = arith.constant 0 : index
    %c0_40 = arith.constant 0 : index
    %38 = vector.load %arg4[%c5, %c0_39, %c0_40] : memref<7x32x128xf32, #tpu.memory_space<vmem>>, vector<1x32x128xf32>
    %39 = vector.shape_cast %38 : vector<1x32x128xf32> to vector<32x128xf32>
    %cst_41 = arith.constant dense<0.000000e+00> : vector<128x128xf32>
    %40 = tpu.matmul %37, %39, %cst_41 {dimension_numbers = #tpu.dot_dimension_numbers<[1], [0], [0], [1], [0, 0, 1, 1], [], []>} : vector<128x32xf32>, vector<32x128xf32>, vector<128x128xf32> -> vector<128x128xf32>
    %41 = arith.addf %36, %40 : vector<128x128xf32>
    %c12 = arith.constant 12 : index
    %c0_42 = arith.constant 0 : index
    %42 = vector.load %arg11[%c12, %c0_42] : memref<144x32xf32, #tpu.memory_space<vmem>>, vector<128x32xf32>
    %c6_43 = arith.constant 6 : index
    %c0_44 = arith.constant 0 : index
    %c0_45 = arith.constant 0 : index
    %43 = vector.load %arg4[%c6_43, %c0_44, %c0_45] : memref<7x32x128xf32, #tpu.memory_space<vmem>>, vector<1x32x128xf32>
    %44 = vector.shape_cast %43 : vector<1x32x128xf32> to vector<32x128xf32>
    %cst_46 = arith.constant dense<0.000000e+00> : vector<128x128xf32>
    %45 = tpu.matmul %42, %44, %cst_46 {dimension_numbers = #tpu.dot_dimension_numbers<[1], [0], [0], [1], [0, 0, 1, 1], [], []>} : vector<128x32xf32>, vector<32x128xf32>, vector<128x128xf32> -> vector<128x128xf32>
    %46 = arith.addf %41, %45 : vector<128x128xf32>
    %cst_47 = arith.constant 5.000000e-01 : f32
    %47 = vector.broadcast %cst_47 : f32 to vector<128x128xf32>
    %48 = arith.mulf %47, %46 : vector<128x128xf32>
    %cst_48 = arith.constant 0.707106769 : f32
    %49 = vector.broadcast %cst_48 : f32 to vector<128x128xf32>
    %50 = arith.mulf %46, %49 : vector<128x128xf32>
    %51 = math.erf %50 : vector<128x128xf32>
    %cst_49 = arith.constant 1.000000e+00 : f32
    %52 = vector.broadcast %cst_49 : f32 to vector<128x128xf32>
    %53 = arith.addf %52, %51 : vector<128x128xf32>
    %54 = arith.mulf %48, %53 : vector<128x128xf32>
    %c0_50 = arith.constant 0 : index
    %c0_51 = arith.constant 0 : index
    %55 = vector.load %arg6[%c0_50, %c0_51] : memref<128x32xf32, #tpu.memory_space<vmem>>, vector<128x32xf32>
    %cst_52 = arith.constant dense<0.000000e+00> : vector<128x32xf32>
    %56 = tpu.matmul %54, %55, %cst_52 {dimension_numbers = #tpu.dot_dimension_numbers<[1], [0], [0], [1], [0, 0, 1, 1], [], []>} : vector<128x128xf32>, vector<128x32xf32>, vector<128x32xf32> -> vector<128x32xf32>
    %c0_53 = arith.constant 0 : index
    %c0_54 = arith.constant 0 : index
    %57 = vector.load %arg7[%c0_53, %c0_54] : memref<1x32xf32, #tpu.memory_space<vmem>>, vector<1x32xf32>
    %58 = vector.broadcast %57 : vector<1x32xf32> to vector<128x32xf32>
    %59 = arith.addf %56, %58 : vector<128x32xf32>
    %c0_55 = arith.constant 0 : index
    %c0_56 = arith.constant 0 : index
    %c0_57 = arith.constant 0 : index
    %60 = vector.load %arg3[%c0_55, %c0_56, %c0_57] : memref<1x128x32xf32, #tpu.memory_space<vmem>>, vector<1x128x32xf32>
    %61 = vector.shape_cast %60 : vector<1x128x32xf32> to vector<128x32xf32>
    %62 = arith.addf %59, %61 : vector<128x32xf32>
    %cst_58 = arith.constant dense<0.000000e+00> : vector<128xf32>
    %63 = vector.multi_reduction <add>, %62, %cst_58 [1] : vector<128x32xf32> to vector<128xf32>
    %64 = vector.shape_cast %63 : vector<128xf32> to vector<128x1xf32>
    %cst_59 = arith.constant 3.200000e+01 : f32
    %65 = vector.broadcast %cst_59 : f32 to vector<128x1xf32>
    %66 = arith.divf %64, %65 : vector<128x1xf32>
    %67 = vector.broadcast %66 : vector<128x1xf32> to vector<128x32xf32>
    %68 = arith.subf %62, %67 : vector<128x32xf32>
    %69 = arith.mulf %68, %68 : vector<128x32xf32>
    %cst_60 = arith.constant dense<0.000000e+00> : vector<128xf32>
    %70 = vector.multi_reduction <add>, %69, %cst_60 [1] : vector<128x32xf32> to vector<128xf32>
    %71 = vector.shape_cast %70 : vector<128xf32> to vector<128x1xf32>
    %cst_61 = arith.constant 3.200000e+01 : f32
    %72 = vector.broadcast %cst_61 : f32 to vector<128x1xf32>
    %73 = arith.divf %71, %72 : vector<128x1xf32>
    %cst_62 = arith.constant 9.99999974E-6 : f32
    %74 = vector.broadcast %cst_62 : f32 to vector<128x1xf32>
    %75 = arith.addf %73, %74 : vector<128x1xf32>
    %76 = math.rsqrt %75 : vector<128x1xf32>
    %77 = vector.broadcast %76 : vector<128x1xf32> to vector<128x32xf32>
    %78 = arith.mulf %68, %77 : vector<128x32xf32>
    %c0_63 = arith.constant 0 : index
    %c0_64 = arith.constant 0 : index
    %79 = vector.load %arg8[%c0_63, %c0_64] : memref<1x32xf32, #tpu.memory_space<vmem>>, vector<1x32xf32>
    %80 = vector.broadcast %79 : vector<1x32xf32> to vector<128x32xf32>
    %81 = arith.mulf %78, %80 : vector<128x32xf32>
    %c0_65 = arith.constant 0 : index
    %c0_66 = arith.constant 0 : index
    %82 = vector.load %arg9[%c0_65, %c0_66] : memref<1x32xf32, #tpu.memory_space<vmem>>, vector<1x32xf32>
    %83 = vector.broadcast %82 : vector<1x32xf32> to vector<128x32xf32>
    %84 = arith.addf %81, %83 : vector<128x32xf32>
    %c0_67 = arith.constant 0 : index
    %c0_68 = arith.constant 0 : index
    %c0_69 = arith.constant 0 : index
    %85 = vector.load %arg10[%c0_67, %c0_68, %c0_69] : memref<1x128x32xf32, #tpu.memory_space<vmem>>, vector<1x128x32xf32>
    %86 = vector.shape_cast %85 : vector<1x128x32xf32> to vector<128x32xf32>
    %87 = vector.shape_cast %84 : vector<128x32xf32> to vector<1x128x32xf32>
    tpu.vector_store %arg10[%c0_67, %c0_68, %c0_69], %87 {strides = array<i32>} : memref<1x128x32xf32, #tpu.memory_space<vmem>>, vector<1x128x32xf32>,
    return
  }
  func.func @transform_0(%arg0: i32, %arg1: i32) -> (i32, i32, i32, i32) {
    %c0_i32 = arith.constant 0 : i32
    %c0_i32_0 = arith.constant 0 : i32
    %c0_i32_1 = arith.constant 0 : i32
    return %arg0, %arg1, %c0_i32, %c0_i32_0 : i32, i32, i32, i32
  }
  func.func @transform_1(%arg0: i32, %arg1: i32) -> (i32, i32, i32) {
    %c0_i32 = arith.constant 0 : i32
    %c0_i32_0 = arith.constant 0 : i32
    return %arg0, %arg1, %c0_i32 : i32, i32, i32
  }
  func.func @transform_2(%arg0: i32, %arg1: i32) -> (i32, i32, i32) {
    %c0_i32 = arith.constant 0 : i32
    %c0_i32_0 = arith.constant 0 : i32
    %c0_i32_1 = arith.constant 0 : i32
    %c0_i32_2 = arith.constant 0 : i32
    return %c0_i32, %c0_i32_0, %c0_i32_1 : i32, i32, i32
  }
  func.func @transform_3(%arg0: i32, %arg1: i32) -> (i32, i32) {
    %c0_i32 = arith.constant 0 : i32
    %c0_i32_0 = arith.constant 0 : i32
    %c0_i32_1 = arith.constant 0 : i32
    return %c0_i32, %c0_i32_0 : i32, i32
  }
  func.func @transform_4(%arg0: i32, %arg1: i32) -> (i32, i32) {
    %c0_i32 = arith.constant 0 : i32
    %c0_i32_0 = arith.constant 0 : i32
    %c0_i32_1 = arith.constant 0 : i32
    return %c0_i32, %c0_i32_0 : i32, i32
  }
  func.func @transform_5(%arg0: i32, %arg1: i32) -> (i32, i32) {
    %c0_i32 = arith.constant 0 : i32
    %c0_i32_0 = arith.constant 0 : i32
    %c0_i32_1 = arith.constant 0 : i32
    return %c0_i32, %c0_i32_0 : i32, i32
  }
  func.func @transform_6(%arg0: i32, %arg1: i32) -> (i32, i32) {
    %c0_i32 = arith.constant 0 : i32
    %c0_i32_0 = arith.constant 0 : i32
    %c0_i32_1 = arith.constant 0 : i32
    return %c0_i32, %c0_i32_0 : i32, i32
  }
  func.func @transform_7(%arg0: i32, %arg1: i32) -> (i32, i32) {
    %c0_i32 = arith.constant 0 : i32
    %c0_i32_0 = arith.constant 0 : i32
    %c0_i32_1 = arith.constant 0 : i32
    return %c0_i32, %c0_i32_0 : i32, i32
  }
  func.func @transform_8(%arg0: i32, %arg1: i32) -> (i32, i32, i32) {
    %c0_i32 = arith.constant 0 : i32
    %c0_i32_0 = arith.constant 0 : i32
    return %arg0, %arg1, %c0_i32 : i32, i32, i32
  }
}

</mosaic_0001>

<bundles_post_ra>
// kernel: tpu_custom_call.1
= control target key start
LH: loop header
LB: loop body
LE: loop exit
PB: predicated region body
PF: predicated region fallthrough
CT: control target
= control target key end

     0   :  { %s3643_s27 = smov 0   ;;  %s3645_s28 = smov 0   ;;  %s4428_s0 = inlined_call_operand.vmem [shape: f32[2,1,8,32], index: 0, kind: input, shape index: {}]   ;;  %s4429_s1 = inlined_call_operand.vmem [shape: f32[2,128,32], index: 1, kind: input, shape index: {}]   ;;  %s4430_s2 = inlined_call_operand.vmem [shape: f32[7,32,128], index: 2, kind: input, shape index: {}]   ;;  %s4431_s3 = inlined_call_operand.vmem [shape: f32[1,128], index: 3, kind: input, shape index: {}]   ;;  %s4432_s4 = inlined_call_operand.vmem [shape: f32[128,32], index: 4, kind: input, shape index: {}]   ;;  %s4433_s5 = inlined_call_operand.vmem [shape: f32[1,32], index: 5, kind: input, shape index: {}]   ;;  %s4434_s6 = inlined_call_operand.vmem [shape: f32[1,32], index: 6, kind: input, shape index: {}]   ;;  %s4435_s7 = inlined_call_operand.vmem [shape: f32[1,32], index: 7, kind: input, shape index: {}]   ;;  %s4436_s8 = inlined_call_operand.vmem [shape: f32[2,128,32], index: 8, kind: output, shape index: {}]  }
   0x1   :  { %s3647_s29 = smov 0  }
   0x2 LB: > { %s30_s30 = sadd.s32 1, %s3592_s28  ;;  %p2684_p0 = scmp.ge.s32.totalorder %s3596_s29, 1  ;;  %s3596_s29 = sphi %s3647_s29, %s18_s29   ;;  %s3592_s28 = sphi %s3645_s28, %s4438_s28   ;;  %s3588_s27 = sphi %s3643_s27, %s4437_s27  }
   0x3   : > { %p32_p1 = scmp.ge.s32.totalorder %s30_s30, 2  ;;  %p297_p2 = scmp.lt.s32.totalorder %s3596_s29, 3 }
   0x5   : > { %s4440_s30 = smov (%p32_p1, %s30_s30), 0  ;;  %p298_p3 = pnand %p2684_p0, %p297_p2 }
   0x6   : > { %v2747_v0 = vld [vmem:[%s4430_s2 + $0x60] sm:$0xff] (!%p298_p3)  ;;  %v2748_v1 = vld [vmem:[%s4430_s2 + $0x68] sm:$0xff] (!%p298_p3)  ;;  %p346_p4 = scmp.lt.s32.totalorder (!%p298_p3), %s3588_s27, 1  ;;  %v2749_v5 = vld [vmem:[%s4430_s2 + $0x70] sm:$0xff] (!%p298_p3)  ;;  %vm374_vm0 = vcmask (!%p298_p3), 257024   ;;  %vm392_vm1 = vcmask (!%p298_p3), 261120  }
   0x7   : > { %301 = sbr.rel (%p298_p3) target bundleno = 921 (0x399), region = 52  ;;  %v434_v2 = vld [vmem:[%s4430_s2] sm:$0xff] (!%p298_p3)  ;;  %v3310_v3 = vpack.c.bf16 (!%p298_p3), %v2748_v1, %v2747_v0  ;;  %v435_v4 = vld [vmem:[%s4430_s2 + $0x8] sm:$0xff] (!%p298_p3)  ;;  %v2750_v6 = vld [vmem:[%s4430_s2 + $0x78] sm:$0xff] (!%p298_p3) }
   0x8   : > { %v3286_v7 = vpack.c.bf16 (!%p298_p3), %v435_v4, %v434_v2  ;;  %v3314_v8 = vpack.c.bf16 (!%p298_p3), %v2750_v6, %v2749_v5  ;;  %v436_v9 = vld [vmem:[%s4430_s2 + $0x10] sm:$0xff] (!%p298_p3)  ;;  %v437_v10 = vld [vmem:[%s4430_s2 + $0x18] sm:$0xff] (!%p298_p3)  ;;  %v2767_v11 = vld [vmem:[%s4430_s2 + $0x80] sm:$0xff] (!%p298_p3) }
   0x9   : > { %3311 = vmatprep.subr.bf16.mxu0 (!%p298_p3), %v3310_v3  ;;  %v3290_v12 = vpack.c.bf16 (!%p298_p3), %v437_v10, %v436_v9  ;;  %v2768_v13 = vld [vmem:[%s4430_s2 + $0x88] sm:$0xff] (!%p298_p3)  ;;  %v2707_v14 = vld [vmem:[%s4430_s2 + $0x20] sm:$0xff] (!%p298_p3)  ;;  %v2769_v29 = vld [vmem:[%s4430_s2 + $0x90] sm:$0xff] (!%p298_p3) }
   0xa   : > { %3287 = vmatprep.subr.bf16.mxu1 (!%p298_p3), %v3286_v7  ;;  %3313 = vmatpush3.bf16.msra.mxu0 (!%p298_p3), %v3310_v3  ;;  %v2708_v15 = vld [vmem:[%s4430_s2 + $0x28] sm:$0xff] (!%p298_p3)  ;;  %v3318_v16 = vpack.c.bf16 (!%p298_p3), %v2768_v13, %v2767_v11  ;;  %v2770_v30 = vld [vmem:[%s4430_s2 + $0x98] sm:$0xff] (!%p298_p3)  ;;  %v2709_v38 = vld [vmem:[%s4430_s2 + $0x30] sm:$0xff] (!%p298_p3) }
   0xb   : > { %3289 = vmatpush3.bf16.msra.mxu1 (!%p298_p3), %v3286_v7  ;;  %3315 = vmatprep.subr.bf16.mxu0 (!%p298_p3), %v3314_v8  ;;  %v3712_v20 = vpack.c.bf16 (!%p298_p3), %v2708_v15, %v2707_v14  ;;  %v3322_v41 = vpack.c.bf16 (!%p298_p3), %v2770_v30, %v2769_v29  ;;  %v2710_v42 = vld [vmem:[%s4430_s2 + $0x38] sm:$0xff] (!%p298_p3)  ;;  %v2787_v47 = vld [vmem:[%s4430_s2 + $0xa0] sm:$0xff] (!%p298_p3)  ;;  %v2788_v48 = vld [vmem:[%s4430_s2 + $0xa8] sm:$0xff] (!%p298_p3) }
   0xc   : > { %3291 = vmatprep.subr.bf16.mxu1 (!%p298_p3), %v3290_v12  ;;  %v3298_v53 = vpack.c.bf16 (!%p298_p3), %v2710_v42, %v2709_v38  ;;  %v3819_v54 = vpack.c.bf16 (!%p298_p3), %v2788_v48, %v2787_v47  ;;  %v2727_v55 = vld [vmem:[%s4430_s2 + $0x40] sm:$0xff] (!%p298_p3)  ;;  %v2728_v56 = vld [vmem:[%s4430_s2 + $0x48] sm:$0xff] (!%p298_p3)  ;;  %v2729_v30 = vld [vmem:[%s4430_s2 + $0x50] sm:$0xff] (!%p298_p3) }
   0xd   : > { %v3837_v61 = vpack.c.bf16 (!%p298_p3), %v2728_v56, %v2727_v55  ;;  %v2730_v38 = vld [vmem:[%s4430_s2 + $0x58] sm:$0xff] (!%p298_p3) }
   0xe   : > { %s4442_s27 = smov (!%p346_p4, %s3588_s27), 1  ;;  %3317 = vmatpush3.bf16.msra.mxu0 %v3314_v8  ;;  %v3306_v47 = vpack.c.bf16 %v2730_v38, %v2729_v30 }
   0xf   : > { %s2685_s11 = sshll.u32 %s4442_s27, 3  ;;  %s2832_s12 = sshll.u32 %s4442_s27, 7  ;;  %3293 = vmatpush3.bf16.msra.mxu1 %v3290_v12  ;;  %3319 = vmatprep.subr.bf16.mxu0 %v3318_v16 }
  0x10   : > { %s352_s19 = scalar_lea.vmem %s4428_s0, %s2685_s11  ;;  %s3709_s22 = scalar_lea.vmem %s4429_s1, %s2832_s12  ;;  %3295 = vmatprep.subr.bf16.mxu1 %v3712_v20 }
  0x11   : > { %v373_v17 = vld [vmem:[%s352_s19] sm:$0xf]  ;;  %v409_v19 = vld [vmem:[%s352_s19 + $0x4] sm:$0xf]  ;;  %v3718_v21 = vld [vmem:[%s3709_s22 + $0x8] sm:$0xff]  ;;  %s4339_s15 = scalar_lea.vmem %s4436_s8, %s2832_s12 }
  0x12   : > { %v376_v18 = vld [vmem:[%s3709_s22] sm:$0xff]  ;;  %375 = vst.msk [vmem:[#allocation2 + $0x4] sm:$0xf] %vm374_vm0, %v373_v17  ;;  %410 = vst.msk [vmem:[#allocation2 + $0x88] sm:$0xf] %vm374_vm0, %v409_v19  ;;  %v378_v22 = vld [vmem:[%s3709_s22 + $0x10] sm:$0xff] }
  0x13   : > { %393 = vst.msk [vmem:[#allocation2 + $0x8] sm:$0xff] %vm392_vm1, %v376_v18  ;;  %v3722_v23 = vld [vmem:[%s3709_s22 + $0x18] sm:$0xff]  ;;  %394 = vst.msk [vmem:[#allocation2 + $0x10] sm:$0xff] %vm392_vm1, %v3718_v21  ;;  %v3730_v24 = vld [vmem:[%s3709_s22 + $0x20] sm:$0xff] }
  0x14   : > { %395 = vst.msk [vmem:[#allocation2 + $0x18] sm:$0xff] %vm392_vm1, %v378_v22  ;;  %396 = vst.msk [vmem:[#allocation2 + $0x20] sm:$0xff] %vm392_vm1, %v3722_v23  ;;  %v381_v25 = vld [vmem:[%s3709_s22 + $0x28] sm:$0xff]  ;;  %v3734_v26 = vld [vmem:[%s3709_s22 + $0x30] sm:$0xff] }
  0x15   : > { %397 = vst.msk [vmem:[#allocation2 + $0x28] sm:$0xff] %vm392_vm1, %v3730_v24  ;;  %398 = vst.msk [vmem:[#allocation2 + $0x30] sm:$0xff] %vm392_vm1, %v381_v25  ;;  %v383_v27 = vld [vmem:[%s3709_s22 + $0x38] sm:$0xff]  ;;  %v3743_v28 = vld [vmem:[%s3709_s22 + $0x40] sm:$0xff] }
  0x16   : > { %399 = vst.msk [vmem:[#allocation2 + $0x38] sm:$0xff] %vm392_vm1, %v3734_v26  ;;  %v3752_v31 = vld [vmem:[%s3709_s22 + $0x48] sm:$0xff]  ;;  %400 = vst.msk [vmem:[#allocation2 + $0x40] sm:$0xff] %vm392_vm1, %v383_v27  ;;  %v3760_v32 = vld [vmem:[%s3709_s22 + $0x50] sm:$0xff] }
  0x17   : > { %401 = vst.msk [vmem:[#allocation2 + $0x48] sm:$0xff] %vm392_vm1, %v3743_v28  ;;  %402 = vst.msk [vmem:[#allocation2 + $0x50] sm:$0xff] %vm392_vm1, %v3752_v31  ;;  %v3763_v33 = vld [vmem:[%s3709_s22 + $0x58] sm:$0xff]  ;;  %v3766_v34 = vld [vmem:[%s3709_s22 + $0x60] sm:$0xff] }
  0x18   : > { %403 = vst.msk [vmem:[#allocation2 + $0x58] sm:$0xff] %vm392_vm1, %v3760_v32  ;;  %404 = vst.msk [vmem:[#allocation2 + $0x60] sm:$0xff] %vm392_vm1, %v3763_v33  ;;  %v3776_v35 = vld [vmem:[%s3709_s22 + $0x68] sm:$0xff]  ;;  %v3779_v36 = vld [vmem:[%s3709_s22 + $0x70] sm:$0xff] }
  0x19   : > { %405 = vst.msk [vmem:[#allocation2 + $0x68] sm:$0xff] %vm392_vm1, %v3766_v34  ;;  %v3782_v37 = vld [vmem:[%s3709_s22 + $0x78] sm:$0xff]  ;;  %406 = vst.msk [vmem:[#allocation2 + $0x70] sm:$0xff] %vm392_vm1, %v3776_v35  ;;  %v2789_v18 = vld [vmem:[%s4430_s2 + $0xb0] sm:$0xff] }
  0x1a   : > { %407 = vst.msk [vmem:[#allocation2 + $0x78] sm:$0xff] %vm392_vm1, %v3779_v36  ;;  %408 = vst.msk [vmem:[#allocation2 + $0x80] sm:$0xff] %vm392_vm1, %v3782_v37  ;;  %v418_v39 = vld [vmem:[#allocation2 + $0x4] sm:$0xff]  ;;  %v3798_v43 = vld [vmem:[#allocation2 + $0xc] sm:$0xff] }
  0x1b   : > { %v1107_v40 = vld [vmem:[#allocation2 + $0x8] sm:$0xff]  ;;  %3014 = vmatprep.mubr.msk.f32.mxu1 %vm392_vm1, %v418_v39  ;;  %v1108_v44 = vld [vmem:[#allocation2 + $0x10] sm:$0xff]  ;;  %v1109_v46 = vld [vmem:[#allocation2 + $0x18] sm:$0xff] }
  0x1c   : > { %3110 = vmatprep.mubr.msk.f32.mxu0 %vm392_vm1, %v1107_v40  ;;  %v3800_v45 = vld [vmem:[#allocation2 + $0x14] sm:$0xff]  ;;  %3015 = vmatmul.mubr.msk.f32.vlgmr.msra.gmra.mrb[0].mxu1 %vm392_vm1, %v3798_v43  ;;  %v3813_v49 = vld [vmem:[#allocation2 + $0x1c] sm:$0xff]  ;;  %v3816_v51 = vld [vmem:[#allocation2 + $0x24] sm:$0xff] }
  0x1d   : > { %3111 = vmatmul.mubr.msk.f32.vlgmr.msra.gmra.mrb[0].mxu0 %vm392_vm1, %v1108_v44  ;;  %3017 = vmatprep.mubr.msk.f32.mxu1 %vm392_vm1, %v3800_v45  ;;  %v1110_v50 = vld [vmem:[#allocation2 + $0x20] sm:$0xff]  ;;  %v1111_v52 = vld [vmem:[#allocation2 + $0x28] sm:$0xff]  ;;  %v1112_v58 = vld [vmem:[#allocation2 + $0x30] sm:$0xff] }
  0x1e   : > { %3321 = vmatpush3.bf16.msra.mxu0 %v3318_v16  ;;  %3113 = vmatprep.mubr.msk.f32.mxu0 %vm392_vm1, %v1109_v46  ;;  %v3833_v57 = vld [vmem:[#allocation2 + $0x2c] sm:$0xff]  ;;  %v3835_v59 = vld [vmem:[#allocation2 + $0x34] sm:$0xff]  ;;  %v3846_v62 = vld [vmem:[#allocation2 + $0x3c] sm:$0xff] }
  0x1f   : > { %3323 = vmatprep.subr.bf16.mxu0 %v3322_v41  ;;  %3297 = vmatpush3.bf16.msra.mxu1 %v3712_v20  ;;  %v1113_v60 = vld [vmem:[#allocation2 + $0x38] sm:$0xff]  ;;  %v1114_v63 = vld [vmem:[#allocation2 + $0x40] sm:$0xff]  ;;  %v1115_v1 = vld [vmem:[#allocation2 + $0x48] sm:$0xff] }
  0x20   : > { %3018 = vmatmul.mubr.msk.f32.gmra.mrb[2].mxu1 %vm392_vm1, %v3813_v49  ;;  %3299 = vmatprep.subr.bf16.mxu1 %v3298_v53  ;;  %v3848_v0 = vld [vmem:[#allocation2 + $0x44] sm:$0xff]  ;;  %v3857_v2 = vld [vmem:[#allocation2 + $0x4c] sm:$0xff]  ;;  %v3859_v4 = vld [vmem:[#allocation2 + $0x54] sm:$0xff] }
  0x21   : > { %3114 = vmatmul.mubr.msk.f32.gmra.mrb[2].mxu0 %vm392_vm1, %v1110_v50  ;;  %3020 = vmatprep.mubr.msk.f32.mxu1 %vm392_vm1, %v3816_v51  ;;  %v1116_v3 = vld [vmem:[#allocation2 + $0x50] sm:$0xff]  ;;  %v1117_v5 = vld [vmem:[#allocation2 + $0x58] sm:$0xff]  ;;  %v1118_v7 = vld [vmem:[#allocation2 + $0x60] sm:$0xff] }
  0x22   : > { %3116 = vmatprep.mubr.msk.f32.mxu0 %vm392_vm1, %v1111_v52  ;;  %3325 = vmatpush3.bf16.msra.mxu0 %v3322_v41  ;;  %v3867_v6 = vld [vmem:[#allocation2 + $0x5c] sm:$0xff]  ;;  %v3869_v8 = vld [vmem:[#allocation2 + $0x64] sm:$0xff]  ;;  %v3877_v10 = vld [vmem:[#allocation2 + $0x6c] sm:$0xff] }
  0x23   : > { %3301 = vmatpush3.bf16.msra.mxu1 %v3298_v53  ;;  %3327 = vmatprep.subr.bf16.mxu0 %v3819_v54  ;;  %v1119_v9 = vld [vmem:[#allocation2 + $0x68] sm:$0xff]  ;;  %v1120_v11 = vld [vmem:[#allocation2 + $0x70] sm:$0xff]  ;;  %v1121_v13 = vld [vmem:[#allocation2 + $0x78] sm:$0xff] }
  0x24   : > { %3021 = vmatmul.mubr.msk.f32.gmra.mrb[4].mxu1 %vm392_vm1, %v3833_v57  ;;  %3303 = vmatprep.subr.bf16.mxu1 %v3837_v61  ;;  %v3879_v12 = vld [vmem:[#allocation2 + $0x74] sm:$0xff]  ;;  %v3887_v14 = vld [vmem:[#allocation2 + $0x7c] sm:$0xff]  ;;  %v647_v16 = vld [vmem:[#allocation2 + $0x6] sm:$0xff] }
  0x25   : > { %3117 = vmatmul.mubr.msk.f32.gmra.mrb[4].mxu0 %vm392_vm1, %v1112_v58  ;;  %3023 = vmatprep.mubr.msk.f32.mxu1 %vm392_vm1, %v3835_v59  ;;  %v1122_v15 = vld [vmem:[#allocation2 + $0x80] sm:$0xff]  ;;  %v1337_v17 = vld [vmem:[#allocation2 + $0x9] sm:$0xff]  ;;  %v2790_v19 = vld [vmem:[%s4430_s2 + $0xb8] sm:$0xff] }
  0x26   : > { %3119 = vmatprep.mubr.msk.f32.mxu0 %vm392_vm1, %v1113_v60  ;;  %v648_v20 = vld [vmem:[#allocation2 + $0xe] sm:$0xff]  ;;  %v649_v25 = vld [vmem:[#allocation2 + $0x16] sm:$0xff]  ;;  %v3330_v27 = vpack.c.bf16 %v2790_v19, %v2789_v18  ;;  %v2807_v39 = vld [vmem:[%s4430_s2 + $0xc0] sm:$0xff] }
  0x27   : > { %v1338_v22 = vld [vmem:[#allocation2 + $0x11] sm:$0xff]  ;;  %v1339_v29 = vld [vmem:[#allocation2 + $0x19] sm:$0xff]  ;;  %v2808_v40 = vld [vmem:[%s4430_s2 + $0xc8] sm:$0xff] }
  0x28   : > { %3024 = vmatmul.mubr.msk.f32.gmra.mrb[6].mxu1 %vm392_vm1, %v3846_v62  ;;  %v650_v41 = vld [vmem:[#allocation2 + $0x1e] sm:$0xff]  ;;  %v651_v44 = vld [vmem:[#allocation2 + $0x26] sm:$0xff]  ;;  %v3918_v48 = vpack.c.bf16 %v2808_v40, %v2807_v39  ;;  %v652_v50 = vld [vmem:[#allocation2 + $0x2e] sm:$0xff] }
  0x29   : > { %3120 = vmatmul.mubr.msk.f32.gmra.mrb[6].mxu0 %vm392_vm1, %v1114_v63  ;;  %3026 = vmatprep.mubr.msk.f32.mxu1 %vm392_vm1, %v3848_v0  ;;  %v1340_v42 = vld [vmem:[#allocation2 + $0x21] sm:$0xff]  ;;  %v1341_v46 = vld [vmem:[#allocation2 + $0x29] sm:$0xff]  ;;  %v1342_v52 = vld [vmem:[#allocation2 + $0x31] sm:$0xff] }
  0x2a   : > { %3122 = vmatprep.mubr.msk.f32.mxu0 %vm392_vm1, %v1115_v1  ;;  %v653_v53 = vld [vmem:[#allocation2 + $0x36] sm:$0xff]  ;;  %v654_v55 = vld [vmem:[#allocation2 + $0x3e] sm:$0xff]  ;;  %v655_v58 = vld [vmem:[#allocation2 + $0x46] sm:$0xff] }
  0x2b   : > { %v1344_v56 = vld [vmem:[#allocation2 + $0x41] sm:$0xff]  ;;  %v1345_v60 = vld [vmem:[#allocation2 + $0x49] sm:$0xff]  ;;  %v1346_v63 = vld [vmem:[#allocation2 + $0x51] sm:$0xff] }
  0x2c   : > { %3027 = vmatmul.mubr.msk.f32.gmra.mrb[8].mxu1 %vm392_vm1, %v3857_v2  ;;  %v657_v1 = vld [vmem:[#allocation2 + $0x56] sm:$0xff]  ;;  %v662_v18 = vld [vmem:[#allocation2 + $0x7e] sm:$0xff] }
  0x2d   : > { %3123 = vmatmul.mubr.msk.f32.gmra.mrb[8].mxu0 %vm392_vm1, %v1116_v3  ;;  %3029 = vmatprep.mubr.msk.f32.mxu1 %vm392_vm1, %v3859_v4  ;;  %v1347_v3 = vld [vmem:[#allocation2 + $0x59] sm:$0xff]  ;;  %v1352_v19 = vld [vmem:[#allocation2 + $0x81] sm:$0xff] }
  0x2e   : > { %3125 = vmatprep.mubr.msk.f32.mxu0 %vm392_vm1, %v1117_v5  ;;  %v658_v5 = vld [vmem:[#allocation2 + $0x5e] sm:$0xff]  ;;  %v1568_v30 = vld [vmem:[#allocation2 + $0x12] sm:$0xff] }
  0x2f   : > { %v879_v38 = vld [vmem:[#allocation2 + $0x17] sm:$0xff] }
  0x30   : > { %3030 = vmatmul.mubr.msk.f32.gmra.mrb[10].mxu1 %vm392_vm1, %v3867_v6  ;;  %v1569_v40 = vld [vmem:[#allocation2 + $0x1a] sm:$0xff] }
  0x31   : > { %3126 = vmatmul.mubr.msk.f32.gmra.mrb[10].mxu0 %vm392_vm1, %v1118_v7  ;;  %3032 = vmatprep.mubr.msk.f32.mxu1 %vm392_vm1, %v3869_v8  ;;  %v1348_v7 = vld [vmem:[#allocation2 + $0x61] sm:$0xff] }
  0x32   : > { %3128 = vmatprep.mubr.msk.f32.mxu0 %vm392_vm1, %v1119_v9  ;;  %v659_v9 = vld [vmem:[#allocation2 + $0x66] sm:$0xff] }
  0x34   : > { %3033 = vmatmul.mubr.msk.f32.gmra.mrb[12].mxu1 %vm392_vm1, %v3877_v10 }
  0x35   : > { %3129 = vmatmul.mubr.msk.f32.gmra.mrb[12].mxu0 %vm392_vm1, %v1120_v11  ;;  %3035 = vmatprep.mubr.msk.f32.mxu1 %vm392_vm1, %v3879_v12  ;;  %v1349_v11 = vld [vmem:[#allocation2 + $0x69] sm:$0xff] }
  0x36   : > { %3131 = vmatprep.mubr.msk.f32.mxu0 %vm392_vm1, %v1121_v13  ;;  %v660_v13 = vld [vmem:[#allocation2 + $0x6e] sm:$0xff] }
  0x38   : > { %3036 = vmatmul.mubr.msk.f32.gmra.mrb[14].mxu1 %vm392_vm1, %v3887_v14 }
  0x39   : > { %3132 = vmatmul.mubr.msk.f32.gmra.mrb[14].mxu0 %vm392_vm1, %v1122_v15  ;;  %3046 = vmatprep.mubr.msk.f32.mxu1 %vm392_vm1, %v647_v16  ;;  %v1350_v15 = vld [vmem:[#allocation2 + $0x71] sm:$0xff] }
  0x3a   : > { %3142 = vmatprep.mubr.msk.f32.mxu0 %vm392_vm1, %v1337_v17  ;;  %v661_v16 = vld [vmem:[#allocation2 + $0x76] sm:$0xff] }
  0x3b   : > { %v1351_v17 = vld [vmem:[#allocation2 + $0x79] sm:$0xff] }
  0x3c   : > { %3047 = vmatmul.mubr.msk.f32.vlgmr.msra.gmra.mrb[0].mxu1 %vm392_vm1, %v648_v20  ;;  %v877_v20 = vld [vmem:[#allocation2 + $0x7] sm:$0xff] }
  0x3d   : > { %3143 = vmatmul.mubr.msk.f32.vlgmr.msra.gmra.mrb[0].mxu0 %vm392_vm1, %v1338_v22  ;;  %3049 = vmatprep.mubr.msk.f32.mxu1 %vm392_vm1, %v649_v25  ;;  %v1567_v22 = vld [vmem:[#allocation2 + $0xa] sm:$0xff] }
  0x3e   : > { %3329 = vmatpush3.bf16.msra.mxu0 %v3819_v54  ;;  %3145 = vmatprep.mubr.msk.f32.mxu0 %vm392_vm1, %v1339_v29  ;;  %v1343_v54 = vld [vmem:[#allocation2 + $0x39] sm:$0xff]  ;;  %v2809_v25 = vld [vmem:[%s4430_s2 + $0xd0] sm:$0xff] }
  0x3f   : > { %3331 = vmatprep.subr.bf16.mxu0 %v3330_v27  ;;  %3305 = vmatpush3.bf16.msra.mxu1 %v3837_v61  ;;  %v656_v61 = vld [vmem:[#allocation2 + $0x4e] sm:$0xff] }
  0x40   : > { %3050 = vmatmul.mubr.msk.f32.gmra.mrb[2].mxu1 %vm392_vm1, %v650_v41  ;;  %3307 = vmatprep.subr.bf16.mxu1 %v3306_v47  ;;  %v878_v29 = vld [vmem:[#allocation2 + $0xf] sm:$0xff]  ;;  %v880_v41 = vld [vmem:[#allocation2 + $0x1f] sm:$0xff] }
  0x41   : > { %3146 = vmatmul.mubr.msk.f32.gmra.mrb[2].mxu0 %vm392_vm1, %v1340_v42  ;;  %3052 = vmatprep.mubr.msk.f32.mxu1 %vm392_vm1, %v651_v44  ;;  %v1570_v42 = vld [vmem:[#allocation2 + $0x22] sm:$0xff] }
  0x42   : > { %3148 = vmatprep.mubr.msk.f32.mxu0 %vm392_vm1, %v1341_v46  ;;  %3333 = vmatpush3.bf16.msra.mxu0 %v3330_v27  ;;  %v2810_v27 = vld [vmem:[%s4430_s2 + $0xd8] sm:$0xff]  ;;  %v881_v44 = vld [vmem:[#allocation2 + $0x27] sm:$0xff] }
  0x43   : > { %3309 = vmatpush3.bf16.msra.mxu1 %v3306_v47  ;;  %3335 = vmatprep.subr.bf16.mxu0 %v3918_v48  ;;  %v3338_v39 = vpack.c.bf16 %v2810_v27, %v2809_v25  ;;  %v1571_v46 = vld [vmem:[#allocation2 + $0x2a] sm:$0xff]  ;;  %v2119_v25 = vld [vmem:[%s4432_s4 + $0x60] sm:$0xff] }
  0x44   : > { %3053 = vmatmul.mubr.msk.f32.gmra.mrb[4].mxu1 %vm392_vm1, %v652_v50  ;;  %v882_v47 = vld [vmem:[#allocation2 + $0x2f] sm:$0xff] }
  0x45   : > { %3149 = vmatmul.mubr.msk.f32.gmra.mrb[4].mxu0 %vm392_vm1, %v1342_v52  ;;  %3055 = vmatprep.mubr.msk.f32.mxu1 %vm392_vm1, %v653_v53  ;;  %v1572_v50 = vld [vmem:[#allocation2 + $0x32] sm:$0xff]  ;;  %v1573_v52 = vld [vmem:[#allocation2 + $0x3a] sm:$0xff]  ;;  %v2120_v27 = vld [vmem:[%s4432_s4 + $0x68] sm:$0xff] }
  0x46   : > { %3151 = vmatprep.mubr.msk.f32.mxu0 %vm392_vm1, %v1343_v54  ;;  %v884_v53 = vld [vmem:[#allocation2 + $0x3f] sm:$0xff] }
  0x47   : > { %v1574_v54 = vld [vmem:[#allocation2 + $0x42] sm:$0xff] }
  0x48   : > { %3056 = vmatmul.mubr.msk.f32.gmra.mrb[6].mxu1 %vm392_vm1, %v654_v55  ;;  %v885_v55 = vld [vmem:[#allocation2 + $0x47] sm:$0xff] }
  0x49   : > { %3152 = vmatmul.mubr.msk.f32.gmra.mrb[6].mxu0 %vm392_vm1, %v1344_v56  ;;  %3058 = vmatprep.mubr.msk.f32.mxu1 %vm392_vm1, %v655_v58  ;;  %v1575_v56 = vld [vmem:[#allocation2 + $0x4a] sm:$0xff] }
  0x4a   : > { %3154 = vmatprep.mubr.msk.f32.mxu0 %vm392_vm1, %v1345_v60  ;;  %v886_v58 = vld [vmem:[#allocation2 + $0x4f] sm:$0xff] }
  0x4b   : > { %v1576_v60 = vld [vmem:[#allocation2 + $0x52] sm:$0xff] }
  0x4c   : > { %3059 = vmatmul.mubr.msk.f32.gmra.mrb[8].mxu1 %vm392_vm1, %v656_v61  ;;  %v887_v61 = vld [vmem:[#allocation2 + $0x57] sm:$0xff] }
  0x4d   : > { %3155 = vmatmul.mubr.msk.f32.gmra.mrb[8].mxu0 %vm392_vm1, %v1346_v63  ;;  %3061 = vmatprep.mubr.msk.f32.mxu1 %vm392_vm1, %v657_v1  ;;  %v1577_v63 = vld [vmem:[#allocation2 + $0x5a] sm:$0xff] }
  0x4e   : > { %3157 = vmatprep.mubr.msk.f32.mxu0 %vm392_vm1, %v1347_v3  ;;  %v888_v1 = vld [vmem:[#allocation2 + $0x5f] sm:$0xff] }
  0x4f   : > { %v1578_v3 = vld [vmem:[#allocation2 + $0x62] sm:$0xff] }
  0x50   : > { %3062 = vmatmul.mubr.msk.f32.gmra.mrb[10].mxu1 %vm392_vm1, %v658_v5  ;;  %v889_v5 = vld [vmem:[#allocation2 + $0x67] sm:$0xff] }
  0x51   : > { %3158 = vmatmul.mubr.msk.f32.gmra.mrb[10].mxu0 %vm392_vm1, %v1348_v7  ;;  %3064 = vmatprep.mubr.msk.f32.mxu1 %vm392_vm1, %v659_v9  ;;  %v1579_v7 = vld [vmem:[#allocation2 + $0x6a] sm:$0xff] }
  0x52   : > { %3160 = vmatprep.mubr.msk.f32.mxu0 %vm392_vm1, %v1349_v11  ;;  %v890_v9 = vld [vmem:[#allocation2 + $0x6f] sm:$0xff] }
  0x53   : > { %v1580_v11 = vld [vmem:[#allocation2 + $0x72] sm:$0xff] }
  0x54   : > { %3065 = vmatmul.mubr.msk.f32.gmra.mrb[12].mxu1 %vm392_vm1, %v660_v13  ;;  %v891_v13 = vld [vmem:[#allocation2 + $0x77] sm:$0xff] }
  0x55   : > { %3161 = vmatmul.mubr.msk.f32.gmra.mrb[12].mxu0 %vm392_vm1, %v1350_v15  ;;  %3067 = vmatprep.mubr.msk.f32.mxu1 %vm392_vm1, %v661_v16  ;;  %v1581_v15 = vld [vmem:[#allocation2 + $0x7a] sm:$0xff] }
  0x56   : > { %3163 = vmatprep.mubr.msk.f32.mxu0 %vm392_vm1, %v1351_v17  ;;  %v892_v16 = vld [vmem:[#allocation2 + $0x7f] sm:$0xff] }
  0x57   : > { %v1582_v17 = vld [vmem:[#allocation2 + $0x82] sm:$0xff] }
  0x58   : > { %3068 = vmatmul.mubr.msk.f32.gmra.mrb[14].mxu1 %vm392_vm1, %v662_v18 }
  0x59   : > { %3164 = vmatmul.mubr.msk.f32.gmra.mrb[14].mxu0 %vm392_vm1, %v1352_v19  ;;  %3078 = vmatprep.mubr.msk.f32.mxu1 %vm392_vm1, %v877_v20  ;;  %v2117_v19 = vld [vmem:[%s4432_s4 + $0x50] sm:$0xff]  ;;  %v2118_v20 = vld [vmem:[%s4432_s4 + $0x58] sm:$0xff] }
  0x5a   : > { %3174 = vmatprep.mubr.msk.f32.mxu0 %vm392_vm1, %v1567_v22  ;;  %v3362_v22 = vpack.c.bf16 %v2118_v20, %v2117_v19 }
  0x5c   : > { %3079 = vmatmul.mubr.msk.f32.vlgmr.msra.gmra.mrb[0].mxu1 %vm392_vm1, %v878_v29  ;;  %v3366_v29 = vpack.c.bf16 %v2120_v27, %v2119_v25 }
  0x5d   : > { %3175 = vmatmul.mubr.msk.f32.vlgmr.msra.gmra.mrb[0].mxu0 %vm392_vm1, %v1568_v30  ;;  %3081 = vmatprep.mubr.msk.f32.mxu1 %vm392_vm1, %v879_v38  ;;  %v2121_v30 = vld [vmem:[%s4432_s4 + $0x70] sm:$0xff]  ;;  %v2122_v38 = vld [vmem:[%s4432_s4 + $0x78] sm:$0xff] }
  0x5e   : > { %3337 = vmatpush3.bf16.msra.mxu0 %v3918_v48  ;;  %3177 = vmatprep.mubr.msk.f32.mxu0 %vm392_vm1, %v1569_v40  ;;  %v883_v48 = vld [vmem:[#allocation2 + $0x37] sm:$0xff] }
  0x5f   : > { %3339 = vmatprep.subr.bf16.mxu0 %v3338_v39 }
  0x60   : > { %3082 = vmatmul.mubr.msk.f32.gmra.mrb[2].mxu1 %vm392_vm1, %v880_v41 }
  0x61   : > { %3178 = vmatmul.mubr.msk.f32.gmra.mrb[2].mxu0 %vm392_vm1, %v1570_v42  ;;  %3084 = vmatprep.mubr.msk.f32.mxu1 %vm392_vm1, %v881_v44 }
  0x62   : > { %3180 = vmatprep.mubr.msk.f32.mxu0 %vm392_vm1, %v1571_v46  ;;  %3341 = vmatpush3.bf16.msra.mxu0 %v3338_v39  ;;  %v3370_v39 = vpack.c.bf16 %v2122_v38, %v2121_v30 }
  0x64   : > { %3085 = vmatmul.mubr.msk.f32.gmra.mrb[4].mxu1 %vm392_vm1, %v882_v47 }
  0x65   : > { %3181 = vmatmul.mubr.msk.f32.gmra.mrb[4].mxu0 %vm392_vm1, %v1572_v50  ;;  %3087 = vmatprep.mubr.msk.f32.mxu1 %vm392_vm1, %v883_v48 }
  0x66   : > { %3183 = vmatprep.mubr.msk.f32.mxu0 %vm392_vm1, %v1573_v52 }
  0x68   : > { %3088 = vmatmul.mubr.msk.f32.gmra.mrb[6].mxu1 %vm392_vm1, %v884_v53 }
  0x69   : > { %3184 = vmatmul.mubr.msk.f32.gmra.mrb[6].mxu0 %vm392_vm1, %v1574_v54  ;;  %3090 = vmatprep.mubr.msk.f32.mxu1 %vm392_vm1, %v885_v55 }
  0x6a   : > { %3186 = vmatprep.mubr.msk.f32.mxu0 %vm392_vm1, %v1575_v56 }
  0x6c   : > { %3091 = vmatmul.mubr.msk.f32.gmra.mrb[8].mxu1 %vm392_vm1, %v886_v58 }
  0x6d   : > { %3187 = vmatmul.mubr.msk.f32.gmra.mrb[8].mxu0 %vm392_vm1, %v1576_v60  ;;  %3093 = vmatprep.mubr.msk.f32.mxu1 %vm392_vm1, %v887_v61  ;;  %v4074_v60 = vld [vmem:[%s4431_s3] ss:$0 sm:$0xff] }
  0x6e   : > { %3189 = vmatprep.mubr.msk.f32.mxu0 %vm392_vm1, %v1577_v63 }
  0x70   : > { %3094 = vmatmul.mubr.msk.f32.gmra.mrb[10].mxu1 %vm392_vm1, %v888_v1 }
  0x71   : > { %3190 = vmatmul.mubr.msk.f32.gmra.mrb[10].mxu0 %vm392_vm1, %v1578_v3  ;;  %3096 = vmatprep.mubr.msk.f32.mxu1 %vm392_vm1, %v889_v5 }
  0x72   : > { %3192 = vmatprep.mubr.msk.f32.mxu0 %vm392_vm1, %v1579_v7 }
  0x74   : > { %3097 = vmatmul.mubr.msk.f32.gmra.mrb[12].mxu1 %vm392_vm1, %v890_v9 }
  0x75   : > { %3193 = vmatmul.mubr.msk.f32.gmra.mrb[12].mxu0 %vm392_vm1, %v1580_v11  ;;  %3099 = vmatprep.mubr.msk.f32.mxu1 %vm392_vm1, %v891_v13 }
  0x76   : > { %3195 = vmatprep.mubr.msk.f32.mxu0 %vm392_vm1, %v1581_v15 }
  0x78   : > { %3100 = vmatmul.mubr.msk.f32.gmra.mrb[14].mxu1 %vm392_vm1, %v892_v16 }
  0x79   : > { %3196 = vmatmul.mubr.msk.f32.gmra.mrb[14].mxu0 %vm392_vm1, %v1582_v17 }
  0x7a   : > { %3206 = vmatprep.mubr.msk.f32.mxu0 %vm392_vm1, %v3798_v43  ;;  %v1812_v43 = vld [vmem:[#allocation2 + $0x84] sm:$0xff] }
  0x7d   : > { %3207 = vmatmul.mubr.msk.f32.vlgmr.msra.gmra.mrb[0].mxu0 %vm392_vm1, %v3800_v45  ;;  %v2107_v45 = vld [vmem:[%s4432_s4] sm:$0xff] }
  0x7e   : > { %3209 = vmatprep.mubr.msk.f32.mxu0 %vm392_vm1, %v3813_v49  ;;  %v2108_v49 = vld [vmem:[%s4432_s4 + $0x8] sm:$0xff] }
  0x81   : > { %3210 = vmatmul.mubr.msk.f32.gmra.mrb[2].mxu0 %vm392_vm1, %v3816_v51  ;;  %v3342_v51 = vpack.c.bf16 %v2108_v49, %v2107_v45 }
  0x82   : > { %3212 = vmatprep.mubr.msk.f32.mxu0 %vm392_vm1, %v3833_v57  ;;  %v2109_v57 = vld [vmem:[%s4432_s4 + $0x10] sm:$0xff] }
  0x83   : > { %3343 = vmatprep.subr.bf16.mxu1 %v3342_v51 }
  0x84   : > { %3345 = vmatpush3.bf16.msra.mxu1 %v3342_v51 }
  0x85   : > { %3213 = vmatmul.mubr.msk.f32.gmra.mrb[4].mxu0 %vm392_vm1, %v3835_v59  ;;  %v2110_v59 = vld [vmem:[%s4432_s4 + $0x18] sm:$0xff] }
  0x86   : > { %3215 = vmatprep.mubr.msk.f32.mxu0 %vm392_vm1, %v3846_v62  ;;  %v3346_v62 = vpack.c.bf16 %v2110_v59, %v2109_v57 }
  0x88   : > { %3347 = vmatprep.subr.bf16.mxu1 %v3346_v62 }
  0x89   : > { %3216 = vmatmul.mubr.msk.f32.gmra.mrb[6].mxu0 %vm392_vm1, %v3848_v0  ;;  %3349 = vmatpush3.bf16.msra.mxu1 %v3346_v62  ;;  %v2111_v0 = vld [vmem:[%s4432_s4 + $0x20] sm:$0xff] }
  0x8a   : > { %3218 = vmatprep.mubr.msk.f32.mxu0 %vm392_vm1, %v3857_v2  ;;  %v2112_v2 = vld [vmem:[%s4432_s4 + $0x28] sm:$0xff] }
  0x8d   : > { %3219 = vmatmul.mubr.msk.f32.gmra.mrb[8].mxu0 %vm392_vm1, %v3859_v4  ;;  %v3350_v4 = vpack.c.bf16 %v2112_v2, %v2111_v0 }
  0x8e   : > { %3221 = vmatprep.mubr.msk.f32.mxu0 %vm392_vm1, %v3867_v6  ;;  %v2113_v6 = vld [vmem:[%s4432_s4 + $0x30] sm:$0xff] }
  0x8f   : > { %3351 = vmatprep.subr.bf16.mxu1 %v3350_v4 }
  0x90   : > { %3353 = vmatpush3.bf16.msra.mxu1 %v3350_v4 }
  0x91   : > { %3222 = vmatmul.mubr.msk.f32.gmra.mrb[10].mxu0 %vm392_vm1, %v3869_v8  ;;  %v2114_v8 = vld [vmem:[%s4432_s4 + $0x38] sm:$0xff] }
  0x92   : > { %3224 = vmatprep.mubr.msk.f32.mxu0 %vm392_vm1, %v3877_v10  ;;  %v3354_v10 = vpack.c.bf16 %v2114_v8, %v2113_v6 }
  0x94   : > { %3355 = vmatprep.subr.bf16.mxu1 %v3354_v10 }
  0x95   : > { %3225 = vmatmul.mubr.msk.f32.gmra.mrb[12].mxu0 %vm392_vm1, %v3879_v12  ;;  %3357 = vmatpush3.bf16.msra.mxu1 %v3354_v10  ;;  %v2115_v12 = vld [vmem:[%s4432_s4 + $0x40] sm:$0xff] }
  0x96   : > { %3227 = vmatprep.mubr.msk.f32.mxu0 %vm392_vm1, %v3887_v14  ;;  %v2116_v14 = vld [vmem:[%s4432_s4 + $0x48] sm:$0xff] }
  0x97   : > { %v3358_v18 = vpack.c.bf16 %v2116_v14, %v2115_v12 }
  0x99   : > { %3228 = vmatmul.mubr.msk.f32.gmra.mrb[14].mxu0 %vm392_vm1, %v1812_v43  ;;  %3359 = vmatprep.subr.bf16.mxu1 %v3358_v18 }
  0x9a   : > { %3361 = vmatpush3.bf16.msra.mxu1 %v3358_v18 }
  0x9b   : > { %3363 = vmatprep.subr.bf16.mxu1 %v3362_v22 }
  0x9e   : > { %3365 = vmatpush3.bf16.msra.mxu1 %v3362_v22 }
  0x9f   : > { %3367 = vmatprep.subr.bf16.mxu1 %v3366_v29 }
  0xa2   : > { %3369 = vmatpush3.bf16.msra.mxu1 %v3366_v29 }
  0xa3   : > { %3371 = vmatprep.subr.bf16.mxu1 %v3370_v39 }
  0xa6   : > { %3373 = vmatpush3.bf16.msra.mxu1 %v3370_v39 }
 0x12f   : > { %v3080_v40 = vpop.f32.mrb[0].mxu1 }
 0x130   : > { %v1012_v41 = vpop.f32.mrb[1].mxu1  ;;  %v3374_v1 = vadd.f32 %v3080_v40, %v4074_v60 }
 0x131   : > { %v3376_v3 = vadd.f32 %v4074_v60, %v1012_v41 }
 0x133   : > { %v3083_v42 = vpop.f32.mrb[2].mxu1 }
 0x134   : > { %v1022_v44 = vpop.f32.mrb[3].mxu1  ;;  %v3378_v13 = vadd.f32 %v3083_v42, %v4074_v60 }
 0x135   : > { %v3380_v16 = vadd.f32 %v4074_v60, %v1022_v44 }
 0x137   : > { %v3086_v46 = vpop.f32.mrb[4].mxu1 }
 0x138   : > { %v1032_v47 = vpop.f32.mrb[5].mxu1  ;;  %v3382_v57 = vadd.f32 %v3086_v46, %v4074_v60 }
 0x139   : > { %v3384_v62 = vadd.f32 %v4074_v60, %v1032_v47 }
 0x13b   : > { %v3089_v50 = vpop.f32.mrb[6].mxu1 }
 0x13c   : > { %v1042_v48 = vpop.f32.mrb[7].mxu1  ;;  %v3386_v10 = vadd.f32 %v3089_v50, %v4074_v60 }
 0x13d   : > { %v3388_v14 = vadd.f32 %v4074_v60, %v1042_v48 }
 0x13f   : > { %v3092_v52 = vpop.f32.mrb[8].mxu1 }
 0x140   : > { %v1052_v53 = vpop.f32.mrb[9].mxu1  ;;  %v3390_v29 = vadd.f32 %v3092_v52, %v4074_v60 }
 0x141   : > { %v3392_v39 = vadd.f32 %v4074_v60, %v1052_v53 }
 0x143   : > { %v3095_v54 = vpop.f32.mrb[10].mxu1 }
 0x144   : > { %v4065_v55 = vpop.f32.mrb[11].mxu1 }
 0x147   : > { %v4067_v56 = vpop.f32.mrb[12].mxu1 }
 0x148   : > { %v4069_v58 = vpop.f32.mrb[13].mxu1 }
 0x14b   : > { %v4076_v61 = vpop.f32.mrb[14].mxu1 }
 0x14c   : > { %v4078_v63 = vpop.f32.mrb[15].mxu1 }
 0x150   : > { %v3208_v5 = vpop.f32.mrb[0].mxu0 }
 0x151   : > { %v3375_v7 = vadd.f32 %v3374_v1, %v3208_v5  ;;  %v1932_v9 = vpop.f32.mrb[1].mxu0 }
 0x152   : > { %v3377_v11 = vadd.f32 %v3376_v3, %v1932_v9  ;;  %v3394_v3 = vadd.f32 %v3095_v54, %v4074_v60 }
 0x153   : > { %v2044_v15 = vmul.f32 0.70710677, %v3375_v7  ;;  %v2028_v48 = vmul.f32 0.5, %v3375_v7 }
 0x154   : > { %v2043_v17 = vmul.f32 0.70710677, %v3377_v11  ;;  %v3211_v43 = vpop.f32.mrb[2].mxu0  ;;  %v2027_v44 = vmul.f32 0.5, %v3377_v11 }
 0x155   : > { %3510 = verf.f32 %v2044_v15  ;;  %v3379_v45 = vadd.f32 %v3378_v13, %v3211_v43  ;;  %v1942_v49 = vpop.f32.mrb[3].mxu0  ;;  %v3396_v13 = vadd.f32 %v4074_v60, %v4065_v55  ;;  %v3398_v55 = vadd.f32 %v4067_v56, %v4074_v60 }
 0x156   : > { %3512 = verf.f32 %v2043_v17  ;;  %v3381_v51 = vadd.f32 %v3380_v16, %v1942_v49 }
 0x157   : > { %v2046_v59 = vmul.f32 0.70710677, %v3379_v45  ;;  %v2030_v54 = vmul.f32 0.5, %v3379_v45 }
 0x158   : > { %v2045_v0 = vmul.f32 0.70710677, %v3381_v51  ;;  %v3214_v2 = vpop.f32.mrb[4].mxu0  ;;  %v2029_v43 = vmul.f32 0.5, %v3381_v51  ;;  %v3400_v51 = vadd.f32 %v4074_v60, %v4069_v58 }
 0x159   : > { %3514 = verf.f32 %v2046_v59  ;;  %v4086_v4 = vadd.f32 %v3382_v57, %v3214_v2  ;;  %v1952_v6 = vpop.f32.mrb[5].mxu0 }
 0x15a   : > { %3516 = verf.f32 %v2045_v0  ;;  %v3385_v8 = vadd.f32 %v3384_v62, %v1952_v6 }
 0x15b   : > { %v2048_v12 = vmul.f32 0.70710677, %v4086_v4 }
 0x15c   : > { %v2047_v18 = vmul.f32 0.70710677, %v3385_v8  ;;  %v3217_v19 = vpop.f32.mrb[6].mxu0 }
 0x15d   : > { %3518 = verf.f32 %v2048_v12  ;;  %v4091_v20 = vadd.f32 %v3386_v10, %v3217_v19  ;;  %v1962_v22 = vpop.f32.mrb[7].mxu0  ;;  %v2031_v19 = vmul.f32 0.5, %v3385_v8  ;;  %v3404_v8 = vadd.f32 %v4074_v60, %v4078_v63 }
 0x15e   : > { %3520 = verf.f32 %v2047_v18  ;;  %v4093_v25 = vadd.f32 %v3388_v14, %v1962_v22 }
 0x15f   : > { %v3511_v27 = vpop.eup %3510  ;;  %v2050_v30 = vmul.f32 0.70710677, %v4091_v20 }
 0x160   : > { %v3513_v38 = vpop.eup %3512  ;;  %v2076_v40 = vadd.f32 1.0, %v3511_v27  ;;  %v2049_v41 = vmul.f32 0.70710677, %v4093_v25  ;;  %v3220_v42 = vpop.f32.mrb[8].mxu0 }
 0x161   : > { %v2075_v46 = vadd.f32 1.0, %v3513_v38  ;;  %3522 = verf.f32 %v2050_v30  ;;  %v4099_v47 = vadd.f32 %v3390_v29, %v3220_v42  ;;  %v1972_v50 = vpop.f32.mrb[9].mxu0  ;;  %v2032_v29 = vmul.f32 0.5, %v4086_v4 }
 0x162   : > { %3524 = verf.f32 %v2049_v41  ;;  %v4101_v1 = vadd.f32 %v3392_v39, %v1972_v50  ;;  %v2092_v11 = vmul.f32 %v2076_v40, %v2028_v48  ;;  %v3402_v38 = vadd.f32 %v4076_v61, %v4074_v60 }
 0x163   : > { %v3515_v52 = vpop.eup %3514  ;;  %v2052_v5 = vmul.f32 0.70710677, %v4099_v47  ;;  %v2091_v53 = vmul.f32 %v2075_v46, %v2027_v44  ;;  %v2033_v50 = vmul.f32 0.5, %v4093_v25 }
 0x164   : > { %v3517_v9 = vpop.eup %3516  ;;  %v2078_v15 = vadd.f32 1.0, %v3515_v52  ;;  %v2051_v16 = vmul.f32 0.70710677, %v4101_v1  ;;  %v3223_v17 = vpop.f32.mrb[10].mxu0 }
 0x165   : > { %v2077_v7 = vadd.f32 1.0, %v3517_v9  ;;  %3526 = verf.f32 %v2052_v5  ;;  %v4108_v49 = vadd.f32 %v3394_v3, %v3223_v17  ;;  %v1982_v57 = vpop.f32.mrb[11].mxu0  ;;  %3262 = vmatprep.mubr.f32.mxu1 %v2091_v53  ;;  %v2034_v3 = vmul.f32 0.5, %v4091_v20 }
 0x166   : > { %3528 = verf.f32 %v2051_v16  ;;  %v3397_v59 = vadd.f32 %v3396_v13, %v1982_v57  ;;  %3263 = vmatmul.mubr.f32.vlgmr.msra.gmra.mrb[16].mxu1 %v2092_v11  ;;  %v2094_v18 = vmul.f32 %v2078_v15, %v2030_v54  ;;  %v2035_v15 = vmul.f32 0.5, %v4101_v1 }
 0x167   : > { %v3519_v62 = vpop.eup %3518  ;;  %v2054_v0 = vmul.f32 0.70710677, %v4108_v49  ;;  %v2093_v2 = vmul.f32 %v2077_v7, %v2029_v43  ;;  %v2036_v16 = vmul.f32 0.5, %v4099_v47 }
 0x168   : > { %v3521_v6 = vpop.eup %3520  ;;  %v2080_v10 = vadd.f32 1.0, %v3519_v62  ;;  %v2053_v12 = vmul.f32 0.70710677, %v3397_v59  ;;  %v3226_v14 = vpop.f32.mrb[12].mxu0  ;;  %v2037_v54 = vmul.f32 0.5, %v3397_v59 }
 0x169   : > { %v2079_v45 = vadd.f32 1.0, %v3521_v6  ;;  %3530 = verf.f32 %v2054_v0  ;;  %v3399_v22 = vadd.f32 %v3398_v55, %v3226_v14  ;;  %v1992_v27 = vpop.f32.mrb[13].mxu0  ;;  %3265 = vmatprep.mubr.f32.mxu1 %v2093_v2  ;;  %v2038_v55 = vmul.f32 0.5, %v4108_v49 }
 0x16a   : > { %3532 = verf.f32 %v2053_v12  ;;  %v3401_v56 = vadd.f32 %v3400_v51, %v1992_v27  ;;  %3266 = vmatmul.mubr.f32.gmra.mrb[18].mxu1 %v2094_v18  ;;  %v2096_v46 = vmul.f32 %v2080_v10, %v2032_v29 }
 0x16b   : > { %v3523_v30 = vpop.eup %3522  ;;  %v2056_v58 = vmul.f32 0.70710677, %v3399_v22  ;;  %v2095_v39 = vmul.f32 %v2079_v45, %v2031_v19  ;;  %v2040_v12 = vmul.f32 0.5, %v3399_v22  ;;  %v4128_v22 = vld [vmem:[%s4433_s5] ss:$0 sm:$0xff] }
 0x16c   : > { %v3525_v40 = vpop.eup %3524  ;;  %v2082_v41 = vadd.f32 1.0, %v3523_v30  ;;  %v2055_v42 = vmul.f32 0.70710677, %v3401_v56  ;;  %v3229_v44 = vpop.f32.mrb[14].mxu0  ;;  %v2039_v10 = vmul.f32 0.5, %v3401_v56 }
 0x16d   : > { %v2081_v4 = vadd.f32 1.0, %v3525_v40  ;;  %3534 = verf.f32 %v2056_v58  ;;  %v3403_v48 = vadd.f32 %v3402_v38, %v3229_v44  ;;  %v2002_v52 = vpop.f32.mrb[15].mxu0  ;;  %3268 = vmatprep.mubr.f32.mxu1 %v2095_v39 }
 0x16e   : > { %3536 = verf.f32 %v2055_v42  ;;  %v3405_v61 = vadd.f32 %v3404_v8, %v2002_v52  ;;  %3269 = vmatmul.mubr.f32.gmra.mrb[20].mxu1 %v2096_v46  ;;  %v2098_v11 = vmul.f32 %v2082_v41, %v2034_v3  ;;  %v2275_v8 = vld [vmem:[%s3709_s22] sm:$0xff]  ;;  %v2277_v52 = vld [vmem:[%s3709_s22 + $0x10] sm:$0xff] }
 0x16f   : > { %v3527_v5 = vpop.eup %3526  ;;  %v2058_v53 = vmul.f32 0.70710677, %v3403_v48  ;;  %v2097_v9 = vmul.f32 %v2081_v4, %v2033_v50  ;;  %v2042_v49 = vmul.f32 0.5, %v3403_v48 }
 0x170   : > { %v3529_v60 = vpop.eup %3528  ;;  %v2084_v63 = vadd.f32 1.0, %v3527_v5  ;;  %v2057_v13 = vmul.f32 0.70710677, %v3405_v61  ;;  %v2041_v27 = vmul.f32 0.5, %v3405_v61 }
 0x171   : > { %v2083_v25 = vadd.f32 1.0, %v3529_v60  ;;  %3538 = verf.f32 %v2058_v53  ;;  %3271 = vmatprep.mubr.f32.mxu1 %v2097_v9 }
 0x172   : > { %3540 = verf.f32 %v2057_v13  ;;  %3272 = vmatmul.mubr.f32.gmra.mrb[22].mxu1 %v2098_v11  ;;  %v2100_v57 = vmul.f32 %v2084_v63, %v2036_v16  ;;  %v2280_v13 = vld [vmem:[%s3709_s22 + $0x28] sm:$0xff] }
 0x173   : > { %v3531_v20 = vpop.eup %3530  ;;  %v2099_v17 = vmul.f32 %v2083_v25, %v2035_v15 }
 0x174   : > { %v3533_v43 = vpop.eup %3532  ;;  %v2086_v7 = vadd.f32 1.0, %v3531_v20 }
 0x175   : > { %v2085_v62 = vadd.f32 1.0, %v3533_v43  ;;  %3274 = vmatprep.mubr.f32.mxu1 %v2099_v17 }
 0x176   : > { %3275 = vmatmul.mubr.f32.gmra.mrb[24].mxu1 %v2100_v57  ;;  %v2102_v51 = vmul.f32 %v2086_v7, %v2038_v55  ;;  %v2282_v7 = vld [vmem:[%s3709_s22 + $0x38] sm:$0xff] }
 0x177   : > { %v3535_v0 = vpop.eup %3534  ;;  %v2101_v1 = vmul.f32 %v2085_v62, %v2037_v54 }
 0x178   : > { %v3537_v2 = vpop.eup %3536  ;;  %v2088_v6 = vadd.f32 1.0, %v3535_v0 }
 0x179   : > { %v2087_v47 = vadd.f32 1.0, %v3537_v2  ;;  %3277 = vmatprep.mubr.f32.mxu1 %v2101_v1 }
 0x17a   : > { %3278 = vmatmul.mubr.f32.gmra.mrb[26].mxu1 %v2102_v51  ;;  %v2104_v59 = vmul.f32 %v2088_v6, %v2040_v12 }
 0x17b   : > { %v3539_v14 = vpop.eup %3538  ;;  %v2103_v18 = vmul.f32 %v2087_v47, %v2039_v10 }
 0x17c   : > { %v3541_v19 = vpop.eup %3540  ;;  %v2090_v45 = vadd.f32 1.0, %v3539_v14 }
 0x17d   : > { %v2089_v29 = vadd.f32 1.0, %v3541_v19  ;;  %3280 = vmatprep.mubr.f32.mxu1 %v2103_v18 }
 0x17e   : > { %3281 = vmatmul.mubr.f32.gmra.mrb[28].mxu1 %v2104_v59  ;;  %v2106_v38 = vmul.f32 %v2090_v45, %v2042_v49 }
 0x17f   : > { %v2105_v30 = vmul.f32 %v2089_v29, %v2041_v27 }
 0x181   : > { %3283 = vmatprep.mubr.f32.mxu1 %v2105_v30 }
 0x182   : > { %3284 = vmatmul.mubr.f32.gmra.mrb[30].mxu1 %v2106_v38 }
 0x239   : > { %v3264_v56 = vpop.f32.mrb[16].mxu1 }
 0x23a   : > { %v2202_v58 = vadd.f32 %v3264_v56, %v4128_v22  ;;  %v2196_v39 = vpop.f32.mrb[17].mxu1 }
 0x23b   : > { %v2197_v40 = vadd.f32 %v4128_v22, %v2196_v39 }
 0x23c   : > { %v4134_v41 = vadd.f32 %v2202_v58, %v3718_v21 }
 0x23d   : > { %v3267_v42 = vpop.f32.mrb[18].mxu1  ;;  %v4139_v4 = vadd.f32 %v2275_v8, %v2197_v40 }
 0x23e   : > { %v2212_v44 = vadd.f32 %v3267_v42, %v4128_v22  ;;  %v2206_v46 = vpop.f32.mrb[19].mxu1  ;;  %v2310_v50 = vsel %vm392_vm1, %v4134_v41, 0.0 }
 0x23f   : > { %v2207_v48 = vadd.f32 %v4128_v22, %v2206_v46  ;;  %2311 = vadd.xlane.f32.xlu0 %v2310_v50  ;;  %v2307_v9 = vsel %vm392_vm1, %v4139_v4, 0.0 }
 0x240   : > { %v4144_v3 = vadd.f32 %v2212_v44, %v3722_v23 }
 0x241   : > { %v3270_v61 = vpop.f32.mrb[20].mxu1  ;;  %v4151_v60 = vadd.f32 %v2277_v52, %v2207_v48 }
 0x242   : > { %v2222_v21 = vadd.f32 %v3270_v61, %v4128_v22  ;;  %v2216_v5 = vpop.f32.mrb[21].mxu1  ;;  %v2316_v53 = vsel %vm392_vm1, %v4144_v3, 0.0 }
 0x243   : > { %v2217_v63 = vadd.f32 %v4128_v22, %v2216_v5  ;;  %2317 = vadd.xlane.f32.xlu1 %v2316_v53  ;;  %2308 = vadd.xlane.f32.xlu0 %v2307_v9  ;;  %v2313_v16 = vsel %vm392_vm1, %v4151_v60, 0.0 }
 0x244   : > { %v4161_v20 = vadd.f32 %v2280_v13, %v2222_v21 }
 0x245   : > { %v3273_v23 = vpop.f32.mrb[22].mxu1  ;;  %v4156_v11 = vadd.f32 %v2217_v63, %v3730_v24 }
 0x246   : > { %v2232_v15 = vadd.f32 %v3273_v23, %v4128_v22  ;;  %v2226_v25 = vpop.f32.mrb[23].mxu1  ;;  %v2322_v55 = vsel %vm392_vm1, %v4161_v20, 0.0 }
 0x247   : > { %v2227_v17 = vadd.f32 %v4128_v22, %v2226_v25  ;;  %2314 = vadd.xlane.f32.xlu1 %v2313_v16  ;;  %v2319_v43 = vsel %vm392_vm1, %v4156_v11, 0.0 }
 0x248   : > { %2320 = vadd.xlane.f32.xlu0 %v2319_v43  ;;  %v4173_v0 = vadd.f32 %v2282_v7, %v2232_v15 }
 0x249   : > { %v3276_v57 = vpop.f32.mrb[24].mxu1  ;;  %v4168_v24 = vadd.f32 %v2227_v17, %v3734_v26 }
 0x24a   : > { %v2242_v54 = vadd.f32 %v3276_v57, %v4128_v22  ;;  %v2236_v62 = vpop.f32.mrb[25].mxu1  ;;  %v2328_v47 = vsel %vm392_vm1, %v4173_v0, 0.0 }
 0x24b   : > { %v2237_v1 = vadd.f32 %v4128_v22, %v2236_v62  ;;  %2323 = vadd.xlane.f32.xlu1 %v2322_v55  ;;  %v2325_v2 = vsel %vm392_vm1, %v4168_v24, 0.0 }
 0x24c   : > { %2326 = vadd.xlane.f32.xlu0 %v2325_v2  ;;  %v4185_v12 = vadd.f32 %v2242_v54, %v3752_v31 }
 0x24d   : > { %v3279_v6 = vpop.f32.mrb[26].mxu1  ;;  %v4179_v51 = vadd.f32 %v2237_v1, %v3743_v28 }
 0x24e   : > { %v2252_v26 = vadd.f32 %v3279_v6, %v4128_v22  ;;  %v2246_v10 = vpop.f32.mrb[27].mxu1  ;;  %v2334_v27 = vsel %vm392_vm1, %v4185_v12, 0.0 }
 0x24f   : > { %v2247_v14 = vadd.f32 %v4128_v22, %v2246_v10  ;;  %2329 = vadd.xlane.f32.xlu1 %v2328_v47  ;;  %v2331_v18 = vsel %vm392_vm1, %v4179_v51, 0.0 }
 0x250   : > { %2332 = vadd.xlane.f32.xlu0 %v2331_v18  ;;  %v4197_v31 = vadd.f32 %v2252_v26, %v3763_v33 }
 0x251   : > { %v3282_v19 = vpop.f32.mrb[28].mxu1  ;;  %v4191_v28 = vadd.f32 %v2247_v14, %v3760_v32 }
 0x252   : > { %v2262_v45 = vadd.f32 %v3282_v19, %v4128_v22  ;;  %v2256_v59 = vpop.f32.mrb[29].mxu1  ;;  %v2340_v58 = vsel %vm392_vm1, %v4197_v31, 0.0 }
 0x253   : > { %v2257_v29 = vadd.f32 %v4128_v22, %v2256_v59  ;;  %2335 = vadd.xlane.f32.xlu1 %v2334_v27  ;;  %v2337_v49 = vsel %vm392_vm1, %v4191_v28, 0.0 }
 0x254   : > { %2338 = vadd.xlane.f32.xlu0 %v2337_v49  ;;  %v4209_v33 = vadd.f32 %v2262_v45, %v3776_v35 }
 0x255   : > { %v3285_v30 = vpop.f32.mrb[30].mxu1  ;;  %v4203_v32 = vadd.f32 %v2257_v29, %v3766_v34 }
 0x256   : > { %v2272_v38 = vadd.f32 %v3285_v30, %v4128_v22  ;;  %v2266_v56 = vpop.f32.mrb[31].mxu1  ;;  %v2346_v34 = vsel %vm392_vm1, %v4209_v33, 0.0 }
 0x257   : > { %v2267_v39 = vadd.f32 %v4128_v22, %v2266_v56  ;;  %2341 = vadd.xlane.f32.xlu1 %v2340_v58  ;;  %v2343_v40 = vsel %vm392_vm1, %v4203_v32, 0.0 }
 0x258   : > { %2344 = vadd.xlane.f32.xlu0 %v2343_v40  ;;  %v4220_v42 = vadd.f32 %v2272_v38, %v3782_v37 }
 0x259   : > { %v4215_v8 = vadd.f32 %v2267_v39, %v3779_v36 }
 0x25a   : > { %v2352_v22 = vsel %vm392_vm1, %v4220_v42, 0.0 }
 0x25b   : > { %2347 = vadd.xlane.f32.xlu1 %v2346_v34  ;;  %v2349_v35 = vsel %vm392_vm1, %v4215_v8, 0.0 }
 0x25c   : > { %2350 = vadd.xlane.f32.xlu0 %v2349_v35 }
 0x25f   : > { %2353 = vadd.xlane.f32.xlu1 %v2352_v22 }
 0x2cc   : > { %v2312_v44 = vpop.xlane.xlu0 %2311 }
 0x2cd   : > { %v2357_v46 = vmul.f32 0.03125, %v2312_v44 }
 0x2cf   : > { %v4227_v36 = vsub.f32 %v4134_v41, %v2357_v46 }
 0x2d0   : > { %v2318_v50 = vpop.xlane.xlu1 %2317  ;;  %v2309_v48 = vpop.xlane.xlu0 %2308 }
 0x2d1   : > { %v2359_v52 = vmul.f32 0.03125, %v2318_v50  ;;  %v2356_v61 = vmul.f32 0.03125, %v2309_v48  ;;  %v2389_v37 = vmul.f32 %v4227_v36, %v4227_v36 }
 0x2d3   : > { %v4232_v21 = vsub.f32 %v4144_v3, %v2359_v52  ;;  %v4235_v5 = vsub.f32 %v4139_v4, %v2356_v61  ;;  %v2407_v53 = vsel %vm392_vm1, %v2389_v37, 0.0 }
 0x2d4   : > { %v2315_v9 = vpop.xlane.xlu1 %2314  ;;  %2408 = vadd.xlane.f32.xlu1 %v2407_v53 }
 0x2d5   : > { %v2358_v63 = vmul.f32 0.03125, %v2315_v9  ;;  %v2321_v41 = vpop.xlane.xlu0 %2320  ;;  %v2391_v13 = vmul.f32 %v4232_v21, %v4232_v21  ;;  %v2388_v23 = vmul.f32 %v4235_v5, %v4235_v5 }
 0x2d6   : > { %v2360_v15 = vmul.f32 0.03125, %v2321_v41 }
 0x2d7   : > { %v4243_v25 = vsub.f32 %v4151_v60, %v2358_v63  ;;  %v2413_v3 = vsel %vm392_vm1, %v2391_v13, 0.0  ;;  %v2404_v4 = vsel %vm392_vm1, %v2388_v23, 0.0 }
 0x2d8   : > { %v4248_v16 = vsub.f32 %v4156_v11, %v2360_v15  ;;  %v2324_v17 = vpop.xlane.xlu1 %2323  ;;  %2414 = vadd.xlane.f32.xlu1 %v2413_v3  ;;  %2405 = vadd.xlane.f32.xlu0 %v2404_v4 }
 0x2d9   : > { %v2361_v43 = vmul.f32 0.03125, %v2324_v17  ;;  %v2327_v7 = vpop.xlane.xlu0 %2326  ;;  %v2390_v57 = vmul.f32 %v4243_v25, %v4243_v25 }
 0x2da   : > { %v2362_v54 = vmul.f32 0.03125, %v2327_v7  ;;  %v2392_v55 = vmul.f32 %v4248_v16, %v4248_v16 }
 0x2db   : > { %v4253_v62 = vsub.f32 %v4161_v20, %v2361_v43  ;;  %v2410_v60 = vsel %vm392_vm1, %v2390_v57, 0.0 }
 0x2dc   : > { %v4259_v11 = vsub.f32 %v4168_v24, %v2362_v54  ;;  %v2330_v1 = vpop.xlane.xlu1 %2329  ;;  %2411 = vadd.xlane.f32.xlu0 %v2410_v60  ;;  %v2416_v14 = vsel %vm392_vm1, %v2392_v55, 0.0 }
 0x2dd   : > { %v2363_v2 = vmul.f32 0.03125, %v2330_v1  ;;  %v2333_v6 = vpop.xlane.xlu0 %2332  ;;  %v2393_v26 = vmul.f32 %v4253_v62, %v4253_v62 }
 0x2de   : > { %v2364_v10 = vmul.f32 0.03125, %v2333_v6  ;;  %v2394_v18 = vmul.f32 %v4259_v11, %v4259_v11 }
 0x2df   : > { %v4264_v47 = vsub.f32 %v4173_v0, %v2363_v2  ;;  %v2419_v20 = vsel %vm392_vm1, %v2393_v26, 0.0 }
 0x2e0   : > { %v4271_v24 = vsub.f32 %v4179_v51, %v2364_v10  ;;  %v2336_v19 = vpop.xlane.xlu1 %2335  ;;  %2420 = vadd.xlane.f32.xlu1 %v2419_v20  ;;  %2417 = vadd.xlane.f32.xlu0 %v2416_v14  ;;  %v2422_v30 = vsel %vm392_vm1, %v2394_v18, 0.0 }
 0x2e1   : > { %v2365_v45 = vmul.f32 0.03125, %v2336_v19  ;;  %v2339_v59 = vpop.xlane.xlu0 %2338  ;;  %v2395_v27 = vmul.f32 %v4264_v47, %v4264_v47 }
 0x2e2   : > { %v2366_v0 = vmul.f32 0.03125, %v2339_v59  ;;  %v2396_v51 = vmul.f32 %v4271_v24, %v4271_v24  ;;  %v4325_v59 = vld [vmem:[%s4434_s6] ss:$0 sm:$0xff] }
 0x2e3   : > { %v4276_v29 = vsub.f32 %v4185_v12, %v2365_v45  ;;  %v2425_v49 = vsel %vm392_vm1, %v2395_v27, 0.0 }
 0x2e4   : > { %v4283_v38 = vsub.f32 %v4191_v28, %v2366_v0  ;;  %v2342_v56 = vpop.xlane.xlu1 %2341  ;;  %2426 = vadd.xlane.f32.xlu1 %v2425_v49  ;;  %2423 = vadd.xlane.f32.xlu0 %v2422_v30  ;;  %v2428_v22 = vsel %vm392_vm1, %v2396_v51, 0.0 }
 0x2e5   : > { %v2367_v58 = vmul.f32 0.03125, %v2342_v56  ;;  %v2345_v39 = vpop.xlane.xlu0 %2344  ;;  %v2397_v40 = vmul.f32 %v4276_v29, %v4276_v29  ;;  %v4331_v56 = vld [vmem:[%s4435_s7] ss:$0 sm:$0xff] }
 0x2e6   : > { %v2368_v12 = vmul.f32 0.03125, %v2345_v39  ;;  %v2398_v28 = vmul.f32 %v4283_v38, %v4283_v38 }
 0x2e7   : > { %v4288_v34 = vsub.f32 %v4197_v31, %v2367_v58  ;;  %v2431_v35 = vsel %vm392_vm1, %v2397_v40, 0.0 }
 0x2e8   : > { %v4295_v44 = vsub.f32 %v4203_v32, %v2368_v12  ;;  %v2348_v46 = vpop.xlane.xlu1 %2347  ;;  %2432 = vadd.xlane.f32.xlu1 %v2431_v35  ;;  %2429 = vadd.xlane.f32.xlu0 %v2428_v22  ;;  %v2434_v53 = vsel %vm392_vm1, %v2398_v28, 0.0 }
 0x2e9   : > { %v2369_v50 = vmul.f32 0.03125, %v2348_v46  ;;  %v2351_v48 = vpop.xlane.xlu0 %2350  ;;  %v2399_v52 = vmul.f32 %v4288_v34, %v4288_v34 }
 0x2ea   : > { %v2370_v31 = vmul.f32 0.03125, %v2351_v48  ;;  %v2400_v32 = vmul.f32 %v4295_v44, %v4295_v44 }
 0x2eb   : > { %v4300_v61 = vsub.f32 %v4209_v33, %v2369_v50  ;;  %v2437_v37 = vsel %vm392_vm1, %v2399_v52, 0.0 }
 0x2ec   : > { %v4307_v9 = vsub.f32 %v4215_v8, %v2370_v31  ;;  %2438 = vadd.xlane.f32.xlu1 %v2437_v37  ;;  %v2354_v63 = vpop.xlane.xlu1 %2353  ;;  %2435 = vadd.xlane.f32.xlu0 %v2434_v53  ;;  %v2440_v15 = vsel %vm392_vm1, %v2400_v32, 0.0 }
 0x2ed   : > { %v2371_v41 = vmul.f32 0.03125, %v2354_v63  ;;  %v2401_v13 = vmul.f32 %v4300_v61, %v4300_v61 }
 0x2ee   : > { %v2402_v3 = vmul.f32 %v4307_v9, %v4307_v9 }
 0x2ef   : > { %v4312_v33 = vsub.f32 %v4220_v42, %v2371_v41  ;;  %v2443_v23 = vsel %vm392_vm1, %v2401_v13, 0.0 }
 0x2f0   : > { %2444 = vadd.xlane.f32.xlu1 %v2443_v23  ;;  %2441 = vadd.xlane.f32.xlu0 %v2440_v15  ;;  %v2446_v17 = vsel %vm392_vm1, %v2402_v3, 0.0 }
 0x2f1   : > { %v2403_v8 = vmul.f32 %v4312_v33, %v4312_v33 }
 0x2f3   : > { %v2449_v4 = vsel %vm392_vm1, %v2403_v8, 0.0 }
 0x2f4   : > { %2450 = vadd.xlane.f32.xlu1 %v2449_v4  ;;  %2447 = vadd.xlane.f32.xlu0 %v2446_v17 }
 0x361   : > { %v2409_v42 = vpop.xlane.xlu1 %2408 }
 0x362   : > { %v2453_v43 = vmul.f32 0.03125, %v2409_v42 }
 0x364   : > { %v2469_v7 = vadd.f32 1e-05, %v2453_v43 }
 0x365   : > { %v2415_v57 = vpop.xlane.xlu1 %2414  ;;  %v2406_v54 = vpop.xlane.xlu0 %2405 }
 0x366   : > { %3542 = vrsqrt.f32 %v2469_v7  ;;  %v2455_v60 = vmul.f32 0.03125, %v2415_v57  ;;  %v2452_v55 = vmul.f32 0.03125, %v2406_v54 }
 0x368   : > { %v2471_v1 = vadd.f32 1e-05, %v2455_v60  ;;  %v2468_v2 = vadd.f32 1e-05, %v2452_v55 }
 0x369   : > { %v2412_v6 = vpop.xlane.xlu0 %2411 }
 0x36a   : > { %3544 = vrsqrt.f32 %v2471_v1  ;;  %v2454_v26 = vmul.f32 0.03125, %v2412_v6 }
 0x36b   : > { %3546 = vrsqrt.f32 %v2468_v2 }
 0x36c   : > { %v2470_v10 = vadd.f32 1e-05, %v2454_v26 }
 0x36d   : > { %v2421_v20 = vpop.xlane.xlu1 %2420  ;;  %v2418_v14 = vpop.xlane.xlu0 %2417 }
 0x36e   : > { %3548 = vrsqrt.f32 %v2470_v10  ;;  %v2457_v18 = vmul.f32 0.03125, %v2421_v20  ;;  %v2456_v19 = vmul.f32 0.03125, %v2418_v14 }
 0x370   : > { %v3543_v45 = vpop.eup %3542  ;;  %v2473_v27 = vadd.f32 1e-05, %v2457_v18  ;;  %v2472_v0 = vadd.f32 1e-05, %v2456_v19 }
 0x371   : > { %v2501_v49 = vmul.f32 %v3543_v45, %v4227_v36  ;;  %v2427_v30 = vpop.xlane.xlu1 %2426  ;;  %v2424_v51 = vpop.xlane.xlu0 %2423 }
 0x372   : > { %3550 = vrsqrt.f32 %v2473_v27  ;;  %v2459_v58 = vmul.f32 0.03125, %v2427_v30  ;;  %v2458_v39 = vmul.f32 0.03125, %v2424_v51 }
 0x373   : > { %v2524_v40 = vmul.f32 %v4325_v59, %v2501_v49  ;;  %3552 = vrsqrt.f32 %v2472_v0 }
 0x374   : > { %v3545_v12 = vpop.eup %3544  ;;  %v2475_v36 = vadd.f32 1e-05, %v2459_v58  ;;  %v2474_v35 = vadd.f32 1e-05, %v2458_v39 }
 0x375   : > { %v3547_v22 = vpop.eup %3546  ;;  %v2547_v28 = vadd.f32 %v4331_v56, %v2524_v40  ;;  %v2503_v46 = vmul.f32 %v3545_v12, %v4232_v21  ;;  %v2433_v50 = vpop.xlane.xlu1 %2432 }
 0x376   : > { %v2430_v48 = vpop.xlane.xlu0 %2429  ;;  %v2500_v52 = vmul.f32 %v3547_v22, %v4235_v5  ;;  %3554 = vrsqrt.f32 %v2475_v36  ;;  %v2461_v31 = vmul.f32 0.03125, %v2433_v50 }
 0x377   : > { %v2460_v37 = vmul.f32 0.03125, %v2430_v48  ;;  %2563 = vst.msk [vmem:[%s4339_s15 + $0x8] sm:$0xff] %vm392_vm1, %v2547_v28  ;;  %v2526_v53 = vmul.f32 %v4325_v59, %v2503_v46  ;;  %3556 = vrsqrt.f32 %v2474_v35 }
 0x378   : > { %v3549_v32 = vpop.eup %3548  ;;  %v2523_v63 = vmul.f32 %v4325_v59, %v2500_v52  ;;  %v2477_v41 = vadd.f32 1e-05, %v2461_v31 }
 0x379   : > { %v2476_v13 = vadd.f32 1e-05, %v2460_v37  ;;  %v2549_v21 = vadd.f32 %v4331_v56, %v2526_v53  ;;  %v2502_v23 = vmul.f32 %v3549_v32, %v4243_v25  ;;  %v2439_v5 = vpop.xlane.xlu1 %2438 }
 0x37a   : > { %v2436_v15 = vpop.xlane.xlu0 %2435  ;;  %v2546_v3 = vadd.f32 %v4331_v56, %v2523_v63  ;;  %3558 = vrsqrt.f32 %v2477_v41  ;;  %v2463_v8 = vmul.f32 0.03125, %v2439_v5 }
 0x37b   : > { %v2462_v4 = vmul.f32 0.03125, %v2436_v15  ;;  %2565 = vst.msk [vmem:[%s4339_s15 + $0x18] sm:$0xff] %vm392_vm1, %v2549_v21  ;;  %v2525_v17 = vmul.f32 %v4325_v59, %v2502_v23  ;;  %3560 = vrsqrt.f32 %v2476_v13 }
 0x37c   : > { %v3551_v42 = vpop.eup %3550  ;;  %2562 = vst.msk [vmem:[%s4339_s15] sm:$0xff] %vm392_vm1, %v2546_v3  ;;  %v2479_v43 = vadd.f32 1e-05, %v2463_v8 }
 0x37d   : > { %v2478_v7 = vadd.f32 1e-05, %v2462_v4  ;;  %v3553_v57 = vpop.eup %3552  ;;  %v2548_v25 = vadd.f32 %v4331_v56, %v2525_v17  ;;  %v2505_v54 = vmul.f32 %v3551_v42, %v4253_v62  ;;  %v2445_v60 = vpop.xlane.xlu1 %2444 }
 0x37e   : > { %v2442_v55 = vpop.xlane.xlu0 %2441  ;;  %v2504_v1 = vmul.f32 %v3553_v57, %v4248_v16  ;;  %3562 = vrsqrt.f32 %v2479_v43  ;;  %v2465_v2 = vmul.f32 0.03125, %v2445_v60 }
 0x37f   : > { %v2464_v6 = vmul.f32 0.03125, %v2442_v55  ;;  %2564 = vst.msk [vmem:[%s4339_s15 + $0x10] sm:$0xff] %vm392_vm1, %v2548_v25  ;;  %v2528_v26 = vmul.f32 %v4325_v59, %v2505_v54  ;;  %3564 = vrsqrt.f32 %v2478_v7 }
 0x380   : > { %v3555_v10 = vpop.eup %3554  ;;  %v2527_v20 = vmul.f32 %v4325_v59, %v2504_v1  ;;  %v2481_v14 = vadd.f32 1e-05, %v2465_v2 }
 0x381   : > { %v2480_v18 = vadd.f32 1e-05, %v2464_v6  ;;  %v3557_v62 = vpop.eup %3556  ;;  %v2551_v19 = vadd.f32 %v4331_v56, %v2528_v26  ;;  %v2507_v16 = vmul.f32 %v3555_v10, %v4264_v47  ;;  %v2451_v45 = vpop.xlane.xlu1 %2450 }
 0x382   : > { %v2448_v27 = vpop.xlane.xlu0 %2447  ;;  %v2550_v0 = vadd.f32 %v4331_v56, %v2527_v20  ;;  %v2506_v49 = vmul.f32 %v3557_v62, %v4259_v11  ;;  %3566 = vrsqrt.f32 %v2481_v14  ;;  %v2467_v30 = vmul.f32 0.03125, %v2451_v45 }
 0x383   : > { %2567 = vst.msk [vmem:[%s4339_s15 + $0x28] sm:$0xff] %vm392_vm1, %v2551_v19  ;;  %v2530_v51 = vmul.f32 %v4325_v59, %v2507_v16  ;;  %3568 = vrsqrt.f32 %v2480_v18  ;;  %v2466_v58 = vmul.f32 0.03125, %v2448_v27 }
 0x384   : > { %v3559_v39 = vpop.eup %3558  ;;  %2566 = vst.msk [vmem:[%s4339_s15 + $0x20] sm:$0xff] %vm392_vm1, %v2550_v0  ;;  %v2529_v47 = vmul.f32 %v4325_v59, %v2506_v49  ;;  %v2483_v40 = vadd.f32 1e-05, %v2467_v30 }
 0x385   : > { %v3561_v12 = vpop.eup %3560  ;;  %v2553_v36 = vadd.f32 %v4331_v56, %v2530_v51  ;;  %v2509_v11 = vmul.f32 %v3559_v39, %v4276_v29  ;;  %v2482_v35 = vadd.f32 1e-05, %v2466_v58 }
 0x386   : > { %v2552_v22 = vadd.f32 %v4331_v56, %v2529_v47  ;;  %v2508_v28 = vmul.f32 %v3561_v12, %v4271_v24  ;;  %3570 = vrsqrt.f32 %v2483_v40 }
 0x387   : > { %2569 = vst.msk [vmem:[%s4339_s15 + $0x38] sm:$0xff] %vm392_vm1, %v2553_v36  ;;  %v2532_v46 = vmul.f32 %v4325_v59, %v2509_v11  ;;  %3572 = vrsqrt.f32 %v2482_v35 }
 0x388   : > { %v3563_v50 = vpop.eup %3562  ;;  %2568 = vst.msk [vmem:[%s4339_s15 + $0x30] sm:$0xff] %vm392_vm1, %v2552_v22  ;;  %v2531_v48 = vmul.f32 %v4325_v59, %v2508_v28 }
 0x389   : > { %v3565_v29 = vpop.eup %3564  ;;  %v2555_v52 = vadd.f32 %v4331_v56, %v2532_v46  ;;  %v2511_v31 = vmul.f32 %v3563_v50, %v4288_v34 }
 0x38a   : > { %v2554_v24 = vadd.f32 %v4331_v56, %v2531_v48  ;;  %v2510_v37 = vmul.f32 %v3565_v29, %v4283_v38 }
 0x38b   : > { %2571 = vst.msk [vmem:[%s4339_s15 + $0x48] sm:$0xff] %vm392_vm1, %v2555_v52  ;;  %v2534_v53 = vmul.f32 %v4325_v59, %v2511_v31 }
 0x38c   : > { %v3567_v32 = vpop.eup %3566  ;;  %2570 = vst.msk [vmem:[%s4339_s15 + $0x40] sm:$0xff] %vm392_vm1, %v2554_v24  ;;  %v2533_v63 = vmul.f32 %v4325_v59, %v2510_v37 }
 0x38d   : > { %v3569_v41 = vpop.eup %3568  ;;  %v2557_v13 = vadd.f32 %v4331_v56, %v2534_v53  ;;  %v2513_v34 = vmul.f32 %v3567_v32, %v4300_v61 }
 0x38e   : > { %v2556_v21 = vadd.f32 %v4331_v56, %v2533_v63  ;;  %v2512_v38 = vmul.f32 %v3569_v41, %v4295_v44 }
 0x38f   : > { %2573 = vst.msk [vmem:[%s4339_s15 + $0x58] sm:$0xff] %vm392_vm1, %v2557_v13  ;;  %v2536_v23 = vmul.f32 %v4325_v59, %v2513_v34 }
 0x390   : > { %v3571_v5 = vpop.eup %3570  ;;  %2572 = vst.msk [vmem:[%s4339_s15 + $0x50] sm:$0xff] %vm392_vm1, %v2556_v21  ;;  %v2535_v15 = vmul.f32 %v4325_v59, %v2512_v38 }
 0x391   : > { %v3573_v3 = vpop.eup %3572  ;;  %v2559_v8 = vadd.f32 %v4331_v56, %v2536_v23  ;;  %v2515_v61 = vmul.f32 %v3571_v5, %v4312_v33 }
 0x392   : > { %v2558_v4 = vadd.f32 %v4331_v56, %v2535_v15  ;;  %v2514_v44 = vmul.f32 %v3573_v3, %v4307_v9 }
 0x393   : > { %2575 = vst.msk [vmem:[%s4339_s15 + $0x68] sm:$0xff] %vm392_vm1, %v2559_v8  ;;  %v2538_v17 = vmul.f32 %v4325_v59, %v2515_v61 }
 0x394   : > { %2574 = vst.msk [vmem:[%s4339_s15 + $0x60] sm:$0xff] %vm392_vm1, %v2558_v4  ;;  %v2537_v42 = vmul.f32 %v4325_v59, %v2514_v44 }
 0x395   : > { %v2561_v43 = vadd.f32 %v4331_v56, %v2538_v17 }
 0x396   : > { %v2560_v7 = vadd.f32 %v4331_v56, %v2537_v42 }
 0x397   : > { %2577 = vst.msk [vmem:[%s4339_s15 + $0x78] sm:$0xff] %vm392_vm1, %v2561_v43 }
 0x398   : > { %2576 = vst.msk [vmem:[%s4339_s15 + $0x70] sm:$0xff] %vm392_vm1, %v2560_v7 }
 0x399 PF: > { %s18_s29 = sadd.s32 1, %s3596_s29   ;;  %s4437_s27 = smov %s3592_s28 }
 0x39a   : > { %p15_p5 = scmp.ge.s32.totalorder %s18_s29, 4   ;;  %s4438_s28 = smov %s4440_s30 }
 0x39c   :  { %17 = sbr.rel (!%p15_p5) target bundleno = 2 (0x2), region = 91 }

</bundles_post_ra>
